<compile_context>
chip_gen: v7x
topology: tpu7x:2x2x1
jax: 0.10.0
libtpu: 0.0.40
codegen_flags: <defaults>
</compile_context>

<pallas_src>
import jax
import jax.numpy as jnp
from jax.experimental import pallas as pl
from jax.experimental.pallas import tpu as pltpu

EPSILON = 1e-7   # NeuralCleanse default epsilon


def _round_up(x, m):
    return (x + m - 1) // m * m


def _pick_tile_n(n):
    """Batch tile size: >=2 grid steps when possible (v7x megacore), cap 256."""
    n8 = _round_up(max(n, 8), 8)
    if n8 <= 512:
        tile = _round_up(pl.cdiv(n8, 2), 8) if n8 >= 16 else n8
    else:
        # 256 fills the v6e/v7x 256-wide MXU; x dbuf (2*3 MB) + W stays well
        # inside v5e's 16 MiB scoped-VMEM default, so no limit override needed.
        tile = 256
    return min(tile, 256)


# ---------------------------------------------------------------------------
# Hot-path kernel: logits = x @ W' + b'   (batch-tiled, pure MXU + DMA)
# ---------------------------------------------------------------------------
def _classify_kernel(x_ref, w_ref, b_ref, o_ref):
    o_ref[...] = (
        jnp.dot(x_ref[...], w_ref[...], preferred_element_type=jnp.float32)
        + b_ref[...]
    )


def regression_model_forward(x_nchw, mask_tanh, pattern_tanh, norm_mean, norm_std,
                             w_cls, b_cls, *, epsilon=EPSILON):
    """x_nchw: (N,C,H,W); mask_tanh: (1,H,W); pattern_tanh: (C,H,W);
       norm_mean/std: (C,); w_cls: (C*H*W, K); b_cls: (K,)"""
    N, C, H, W = x_nchw.shape
    D = C * H * W
    K = w_cls.shape[1]
    f32 = jnp.float32

    # ---- trigger constants (batch independent, tiny) — plain JAX -----------
    mask = jnp.tanh(mask_tanh.astype(f32)) / (2.0 + epsilon) + 0.5          # (1,H,W)
    pattern = jnp.tanh(pattern_tanh.astype(f32)) / (2.0 + epsilon) + 0.5    # (C,H,W)
    pattern = (pattern - norm_mean.astype(f32)[:, None, None]) \
        / norm_std.astype(f32)[:, None, None]
    mask_c = jnp.broadcast_to(mask, (C, H, W))
    blend_a = (1.0 - mask_c).reshape(D)          # A = 1 - mask
    blend_b = (mask_c * pattern).reshape(D)      # B = mask * norm(pattern)

    # ---- fold blend into the linear head (exact for a linear first layer) --
    # (A*x + B) @ W + b == x @ (diag(A)·W) + (B @ W + b)
    w_fold = blend_a[:, None] * w_cls.astype(f32)                              # (D, K)
    b_fold = (blend_b @ w_cls.astype(f32) + b_cls.astype(f32)).reshape(1, K)   # (1, K)

    x_flat = x_nchw.reshape(N, D).astype(f32)

    # ---- batch-tiled MXU matmul + bias --------------------------------------
    tile_n = _pick_tile_n(N)
    grid = (pl.cdiv(N, tile_n),)   # partial last block OK: OOB writes masked

    cost = pl.CostEstimate(
        flops=2 * N * D * K,
        transcendentals=0,
        bytes_accessed=4 * (N * D + D * K + K + N * K),
    )

    # NOTE: W/bias have constant index_maps; at today's sizes their redundant
    # double-buffer is negligible (<250 KB), so no Buffered(1) override.
    logits = pl.pallas_call(
        _classify_kernel,
        out_shape=jax.ShapeDtypeStruct((N, K), f32),
        grid=grid,
        in_specs=[
            pl.BlockSpec((tile_n, D), lambda i: (i, 0)),   # x tile (dominant traffic)
            pl.BlockSpec((D, K),      lambda i: (0, 0)),   # folded weights (unpadded K)
            pl.BlockSpec((1, K),      lambda i: (0, 0)),   # folded bias
        ],
        out_specs=pl.BlockSpec((tile_n, K), lambda i: (i, 0)),
        compiler_params=pltpu.CompilerParams(
            dimension_semantics=("parallel",)),            # megacore sharding on v7x
        cost_estimate=cost,
    )(x_flat, w_fold, b_fold)

    return logits


def reference_forward(x_nchw, mask_tanh, pattern_tanh, norm_mean, norm_std,
                      w_cls, b_cls, epsilon=EPSILON):
    mask = jnp.tanh(mask_tanh) / (2.0 + epsilon) + 0.5
    pattern = jnp.tanh(pattern_tanh) / (2.0 + epsilon) + 0.5
    pattern = (pattern - norm_mean[:, None, None]) / norm_std[:, None, None]
    xb = (1.0 - mask) * x_nchw + mask * pattern
    N = x_nchw.shape[0]
    return xb.reshape(N, -1) @ w_cls + b_cls


if __name__ == "__main__":
    # CIFAR10-like shapes (normalizer branch): C=3, H=W=32, 10 classes.
    # N=64 keeps it small while exercising a 2-step "parallel" batch grid.
    N, C, H, W, K = 64, 3, 32, 32, 10
    D = C * H * W

    key = jax.random.PRNGKey(0)
    kx, km, kp, kw, kb = jax.random.split(key, 5)

    x = jax.random.uniform(kx, (N, C, H, W), jnp.float32)               # input images
    mask_tanh = 0.5 * jax.random.normal(km, (1, H, W), jnp.float32)     # mask param
    pattern_tanh = 0.5 * jax.random.normal(kp, (C, H, W), jnp.float32)  # pattern param
    w_cls = 0.02 * jax.random.normal(kw, (D, K), jnp.float32)           # synthetic head W
    b_cls = 0.01 * jax.random.normal(kb, (K,), jnp.float32)             # synthetic head b

    # CIFAR10 normalizer constants (forward uses the normalizer branch)
    norm_mean = jnp.array([0.4914, 0.4822, 0.4465], jnp.float32)
    norm_std = jnp.array([0.247, 0.243, 0.261], jnp.float32)

    fwd = jax.jit(regression_model_forward)
    out = jax.block_until_ready(
        fwd(x, mask_tanh, pattern_tanh, norm_mean, norm_std, w_cls, b_cls))

    ref = reference_forward(x, mask_tanh, pattern_tanh, norm_mean, norm_std, w_cls, b_cls)
    assert out.shape == (N, K)
    assert jnp.allclose(out, ref, atol=5e-4, rtol=5e-4), (
        float(jnp.max(jnp.abs(out - ref))))
    print("KERNEL_OK")
</pallas_src>

<mosaic_0001>
module attributes {stable_mosaic.version = 11 : i64} {
  func.func @_classify_kernel(%arg0: i32, %arg1: memref<32x3072xf32, #tpu.memory_space<vmem>>, %arg2: memref<3072x10xf32, #tpu.memory_space<vmem>>, %arg3: memref<1x10xf32, #tpu.memory_space<vmem>>, %arg4: memref<32x10xf32, #tpu.memory_space<vmem>>) attributes {dimension_semantics = [#tpu.dimension_semantics<parallel>], iteration_bounds = array<i64: 2>, scalar_prefetch = 0 : i64, scratch_operands = 0 : i64, tpu.core_type = #tpu.core_type<tc>, window_params = [{transform_indices = @transform_0, window_bounds = array<i64: 32, 3072>}, {pipeline_mode = #tpu.pipeline_mode<synchronous>, transform_indices = @transform_1, window_bounds = array<i64: 3072, 10>}, {pipeline_mode = #tpu.pipeline_mode<synchronous>, transform_indices = @transform_2, window_bounds = array<i64: 1, 10>}, {transform_indices = @transform_3, window_bounds = array<i64: 32, 10>}]} {
    %c0 = arith.constant 0 : index
    %c0_0 = arith.constant 0 : index
    %0 = vector.load %arg1[%c0, %c0_0] : memref<32x3072xf32, #tpu.memory_space<vmem>>, vector<32x3072xf32>
    %c0_1 = arith.constant 0 : index
    %c0_2 = arith.constant 0 : index
    %1 = vector.load %arg2[%c0_1, %c0_2] : memref<3072x10xf32, #tpu.memory_space<vmem>>, vector<3072x10xf32>
    %cst = arith.constant dense<0.000000e+00> : vector<32x10xf32>
    %2 = tpu.matmul %0, %1, %cst {dimension_numbers = #tpu.dot_dimension_numbers<[1], [0], [0], [1], [0, 0, 1, 1], [], []>} : vector<32x3072xf32>, vector<3072x10xf32>, vector<32x10xf32> -> vector<32x10xf32>
    %c0_3 = arith.constant 0 : index
    %c0_4 = arith.constant 0 : index
    %3 = vector.load %arg3[%c0_3, %c0_4] : memref<1x10xf32, #tpu.memory_space<vmem>>, vector<1x10xf32>
    %4 = vector.broadcast %3 : vector<1x10xf32> to vector<32x10xf32>
    %5 = arith.addf %2, %4 : vector<32x10xf32>
    %c0_5 = arith.constant 0 : index
    %c0_6 = arith.constant 0 : index
    %6 = vector.load %arg4[%c0_5, %c0_6] : memref<32x10xf32, #tpu.memory_space<vmem>>, vector<32x10xf32>
    tpu.vector_store %arg4[%c0_5, %c0_6], %5 {strides = array<i32>} : memref<32x10xf32, #tpu.memory_space<vmem>>, vector<32x10xf32>,
    return
  }
  func.func @transform_0(%arg0: i32) -> (i32, i32) {
    %c0_i32 = arith.constant 0 : i32
    %c0_i32_0 = arith.constant 0 : i32
    return %arg0, %c0_i32 : i32, i32
  }
  func.func @transform_1(%arg0: i32) -> (i32, i32) {
    %c0_i32 = arith.constant 0 : i32
    %c0_i32_0 = arith.constant 0 : i32
    %c0_i32_1 = arith.constant 0 : i32
    return %c0_i32, %c0_i32_0 : i32, i32
  }
  func.func @transform_2(%arg0: i32) -> (i32, i32) {
    %c0_i32 = arith.constant 0 : i32
    %c0_i32_0 = arith.constant 0 : i32
    %c0_i32_1 = arith.constant 0 : i32
    return %c0_i32, %c0_i32_0 : i32, i32
  }
  func.func @transform_3(%arg0: i32) -> (i32, i32) {
    %c0_i32 = arith.constant 0 : i32
    %c0_i32_0 = arith.constant 0 : i32
    return %arg0, %c0_i32 : i32, i32
  }
}

</mosaic_0001>

<bundles_post_ra>
// kernel: regression_model_forward.1
= control target key start
LH: loop header
LB: loop body
LE: loop exit
PB: predicated region body
PF: predicated region fallthrough
CT: control target
= control target key end

     0   :  { %s2706_s12 = smov 0   ;;  %s3990_s0 = inlined_call_operand.vmem [shape: f32[64,3072], index: 0, kind: input, shape index: {}]   ;;  %s3991_s1 = inlined_call_operand.vmem [shape: f32[3072,10], index: 1, kind: input, shape index: {}]   ;;  %s3992_s2 = inlined_call_operand.vmem [shape: f32[1,10], index: 2, kind: input, shape index: {}]   ;;  %s3993_s3 = inlined_call_operand.vmem [shape: f32[64,10], index: 3, kind: output, shape index: {}]  }
   0x1 LB: > { %s1745_s13 = sadd.s32 4294967295, %s2684_s12   ;;  %p1749_p0 = scmp.ge.s32.totalorder %s2684_s12, 1  ;;  %s2684_s12 = sphi %s2706_s12, %s13_s12  }
   0x2   : > { %p139_p1 = scmp.lt.s32.totalorder %s2684_s12, 3 }
   0x4   : > { %p140_p2 = pnand %p1749_p0, %p139_p1 }
   0x5   : > { %v289_v0 = vld [vmem:[%s3991_s1 + $0x80] sm:$0xff] (!%p140_p2)  ;;  %v290_v1 = vld [vmem:[%s3991_s1 + $0x88] sm:$0xff] (!%p140_p2)  ;;  %v291_v11 = vld [vmem:[%s3991_s1 + $0x90] sm:$0xff] (!%p140_p2)  ;;  %s2750_s11 = sshll.u32 (!%p140_p2), %s1745_s13, 2  ;;  %vm1684_vm0 = vcmask (!%p140_p2), 80896  }
   0x6   : > { %143 = sbr.rel (%p140_p2) target bundleno = 432 (0x1b0), region = 32  ;;  %v273_v2 = vld [vmem:[%s3991_s1] sm:$0xff] (!%p140_p2)  ;;  %v2285_v3 = vpack.c.bf16 (!%p140_p2), %v290_v1, %v289_v0  ;;  %v274_v4 = vld [vmem:[%s3991_s1 + $0x8] sm:$0xff] (!%p140_p2)  ;;  %v292_v13 = vld [vmem:[%s3991_s1 + $0x98] sm:$0xff] (!%p140_p2)  ;;  %p165_p3 = scmp.lt.s32.totalorder (!%p140_p2), %s2750_s11, 7 }
   0x7   : > { %v321_v5 = vld [vmem:[%s3991_s1 + $0x180] sm:$0xff] (!%p140_p2)  ;;  %v322_v6 = vld [vmem:[%s3991_s1 + $0x188] sm:$0xff] (!%p140_p2)  ;;  %v2287_v7 = vpack.c.bf16 (!%p140_p2), %v274_v4, %v273_v2  ;;  %v275_v14 = vld [vmem:[%s3991_s1 + $0x10] sm:$0xff] (!%p140_p2)  ;;  %v2289_v16 = vpack.c.bf16 (!%p140_p2), %v292_v13, %v291_v11 }
   0x8   : > { %v2317_v8 = vpack.c.bf16 (!%p140_p2), %v322_v6, %v321_v5  ;;  %v305_v9 = vld [vmem:[%s3991_s1 + $0x100] sm:$0xff] (!%p140_p2)  ;;  %v306_v10 = vld [vmem:[%s3991_s1 + $0x108] sm:$0xff] (!%p140_p2)  ;;  %2286 = vmatprep.subr.bf16.mxu0 (!%p140_p2), %v2285_v3  ;;  %v276_v15 = vld [vmem:[%s3991_s1 + $0x18] sm:$0xff] (!%p140_p2) }
   0x9   : > { %v2319_v12 = vpack.c.bf16 (!%p140_p2), %v306_v10, %v305_v9  ;;  %2288 = vmatpush3.bf16.msra.mxu0 (!%p140_p2), %v2287_v7  ;;  %v2291_v17 = vpack.c.bf16 (!%p140_p2), %v276_v15, %v275_v14  ;;  %v323_v18 = vld [vmem:[%s3991_s1 + $0x190] sm:$0xff] (!%p140_p2)  ;;  %v324_v19 = vld [vmem:[%s3991_s1 + $0x198] sm:$0xff] (!%p140_p2)  ;;  %v293_v23 = vld [vmem:[%s3991_s1 + $0xa0] sm:$0xff] (!%p140_p2) }
   0xa   : > { %2318 = vmatprep.subr.bf16.mxu1 (!%p140_p2), %v2317_v8  ;;  %v307_v20 = vld [vmem:[%s3991_s1 + $0x110] sm:$0xff] (!%p140_p2)  ;;  %v2321_v21 = vpack.c.bf16 (!%p140_p2), %v324_v19, %v323_v18  ;;  %v308_v22 = vld [vmem:[%s3991_s1 + $0x118] sm:$0xff] (!%p140_p2)  ;;  %v294_v24 = vld [vmem:[%s3991_s1 + $0xa8] sm:$0xff] (!%p140_p2)  ;;  %2290 = vmatprep.subr.bf16.mxu0 (!%p140_p2), %v2289_v16 }
   0xb   : > { %2320 = vmatpush3.bf16.msra.mxu1 (!%p140_p2), %v2319_v12  ;;  %v2323_v25 = vpack.c.bf16 (!%p140_p2), %v308_v22, %v307_v20  ;;  %v2293_v26 = vpack.c.bf16 (!%p140_p2), %v294_v24, %v293_v23  ;;  %v277_v27 = vld [vmem:[%s3991_s1 + $0x20] sm:$0xff] (!%p140_p2)  ;;  %v278_v28 = vld [vmem:[%s3991_s1 + $0x28] sm:$0xff] (!%p140_p2)  ;;  %v295_v35 = vld [vmem:[%s3991_s1 + $0xb0] sm:$0xff] (!%p140_p2) }
   0xc   : > { %v325_v29 = vld [vmem:[%s3991_s1 + $0x1a0] sm:$0xff] (!%p140_p2)  ;;  %2322 = vmatprep.subr.bf16.mxu1 (!%p140_p2), %v2321_v21  ;;  %v326_v30 = vld [vmem:[%s3991_s1 + $0x1a8] sm:$0xff] (!%p140_p2)  ;;  %v2295_v33 = vpack.c.bf16 (!%p140_p2), %v278_v28, %v277_v27  ;;  %v296_v36 = vld [vmem:[%s3991_s1 + $0xb8] sm:$0xff] (!%p140_p2) }
   0xd   : > { %v309_v31 = vld [vmem:[%s3991_s1 + $0x120] sm:$0xff]  ;;  %v310_v32 = vld [vmem:[%s3991_s1 + $0x128] sm:$0xff]  ;;  %2292 = vmatpush3.bf16.msra.mxu0 %v2291_v17  ;;  %v2325_v34 = vpack.c.bf16 %v326_v30, %v325_v29  ;;  %v279_v37 = vld [vmem:[%s3991_s1 + $0x30] sm:$0xff]  ;;  %v2297_v39 = vpack.c.bf16 %v296_v36, %v295_v35  ;;  %s3995_s11 = smov (!%p165_p3, %s2750_s11), 7 }
   0xe   : > { %2294 = vmatprep.subr.bf16.mxu0 %v2293_v26  ;;  %v2327_v38 = vpack.c.bf16 %v310_v32, %v309_v31  ;;  %v280_v40 = vld [vmem:[%s3991_s1 + $0x38] sm:$0xff]  ;;  %v327_v41 = vld [vmem:[%s3991_s1 + $0x1b0] sm:$0xff]  ;;  %v297_v46 = vld [vmem:[%s3991_s1 + $0xc0] sm:$0xff]  ;;  %s2669_s23 = smul.u32 192, %s3995_s11 }
   0xf   : > { %2324 = vmatpush3.bf16.msra.mxu1 %v2323_v25  ;;  %v328_v42 = vld [vmem:[%s3991_s1 + $0x1b8] sm:$0xff]  ;;  %v311_v44 = vld [vmem:[%s3991_s1 + $0x130] sm:$0xff]  ;;  %v298_v47 = vld [vmem:[%s3991_s1 + $0xc8] sm:$0xff]  ;;  %v2299_v48 = vpack.c.bf16 %v280_v40, %v279_v37 }
  0x10   : > { %2326 = vmatprep.subr.bf16.mxu1 %v2325_v34  ;;  %v2329_v43 = vpack.c.bf16 %v328_v42, %v327_v41  ;;  %v312_v45 = vld [vmem:[%s3991_s1 + $0x138] sm:$0xff]  ;;  %v329_v49 = vld [vmem:[%s3991_s1 + $0x1c0] sm:$0xff]  ;;  %v330_v50 = vld [vmem:[%s3991_s1 + $0x1c8] sm:$0xff]  ;;  %v2301_v52 = vpack.c.bf16 %v298_v47, %v297_v46  ;;  %s2876_s18 = scalar_lea.vmem %s3990_s0, %s2669_s23 }
  0x11   : > { %2296 = vmatpush3.bf16.msra.mxu0 %v2295_v33  ;;  %v2331_v51 = vpack.c.bf16 %v312_v45, %v311_v44  ;;  %v281_v53 = vld [vmem:[%s3991_s1 + $0x40] sm:$0xff]  ;;  %v282_v54 = vld [vmem:[%s3991_s1 + $0x48] sm:$0xff]  ;;  %v2333_v56 = vpack.c.bf16 %v330_v50, %v329_v49  ;;  %v299_v58 = vld [vmem:[%s3991_s1 + $0xd0] sm:$0xff] }
  0x12   : > { %2298 = vmatprep.subr.bf16.mxu0 %v2297_v39  ;;  %v313_v55 = vld [vmem:[%s3991_s1 + $0x140] sm:$0xff]  ;;  %v314_v57 = vld [vmem:[%s3991_s1 + $0x148] sm:$0xff]  ;;  %v300_v59 = vld [vmem:[%s3991_s1 + $0xd8] sm:$0xff]  ;;  %v2303_v62 = vpack.c.bf16 %v282_v54, %v281_v53 }
  0x13   : > { %2328 = vmatpush3.bf16.msra.mxu1 %v2327_v38  ;;  %v331_v60 = vld [vmem:[%s3991_s1 + $0x1d0] sm:$0xff]  ;;  %v332_v61 = vld [vmem:[%s3991_s1 + $0x1d8] sm:$0xff]  ;;  %v2335_v63 = vpack.c.bf16 %v314_v57, %v313_v55  ;;  %v2305_v0 = vpack.c.bf16 %v300_v59, %v299_v58  ;;  %v301_v6 = vld [vmem:[%s3991_s1 + $0xe0] sm:$0xff] }
  0x14   : > { %2330 = vmatprep.subr.bf16.mxu1 %v2329_v43  ;;  %v283_v1 = vld [vmem:[%s3991_s1 + $0x50] sm:$0xff]  ;;  %v284_v2 = vld [vmem:[%s3991_s1 + $0x58] sm:$0xff]  ;;  %v2337_v4 = vpack.c.bf16 %v332_v61, %v331_v60  ;;  %v302_v7 = vld [vmem:[%s3991_s1 + $0xe8] sm:$0xff] }
  0x15   : > { %2300 = vmatpush3.bf16.msra.mxu0 %v2299_v48  ;;  %v315_v3 = vld [vmem:[%s3991_s1 + $0x150] sm:$0xff]  ;;  %v316_v5 = vld [vmem:[%s3991_s1 + $0x158] sm:$0xff]  ;;  %v333_v8 = vld [vmem:[%s3991_s1 + $0x1e0] sm:$0xff]  ;;  %v2307_v10 = vpack.c.bf16 %v284_v2, %v283_v1  ;;  %v2309_v14 = vpack.c.bf16 %v302_v7, %v301_v6 }
  0x16   : > { %2302 = vmatprep.subr.bf16.mxu0 %v2301_v52  ;;  %v334_v9 = vld [vmem:[%s3991_s1 + $0x1e8] sm:$0xff]  ;;  %v285_v11 = vld [vmem:[%s3991_s1 + $0x60] sm:$0xff]  ;;  %v2339_v13 = vpack.c.bf16 %v316_v5, %v315_v3  ;;  %v303_v19 = vld [vmem:[%s3991_s1 + $0xf0] sm:$0xff] }
  0x17   : > { %2332 = vmatpush3.bf16.msra.mxu1 %v2331_v51  ;;  %v286_v12 = vld [vmem:[%s3991_s1 + $0x68] sm:$0xff]  ;;  %v317_v15 = vld [vmem:[%s3991_s1 + $0x160] sm:$0xff]  ;;  %v2341_v18 = vpack.c.bf16 %v334_v9, %v333_v8  ;;  %v304_v20 = vld [vmem:[%s3991_s1 + $0xf8] sm:$0xff] }
  0x18   : > { %2334 = vmatprep.subr.bf16.mxu1 %v2333_v56  ;;  %v318_v16 = vld [vmem:[%s3991_s1 + $0x168] sm:$0xff]  ;;  %v180_v21 = vld [vmem:[%s2876_s18 + $0x18] sm:$0xff]  ;;  %v335_v22 = vld [vmem:[%s3991_s1 + $0x1f0] sm:$0xff]  ;;  %v2311_v24 = vpack.c.bf16 %v286_v12, %v285_v11  ;;  %v2313_v26 = vpack.c.bf16 %v304_v20, %v303_v19 }
  0x19   : > { %2304 = vmatpush3.bf16.msra.mxu0 %v2303_v62  ;;  %v178_v17 = vld [vmem:[%s2876_s18 + $0x8] sm:$0xff]  ;;  %v336_v23 = vld [vmem:[%s3991_s1 + $0x1f8] sm:$0xff]  ;;  %813 = vmatprep.mubr.f32.mxu1 %v180_v21  ;;  %v2343_v25 = vpack.c.bf16 %v318_v16, %v317_v15  ;;  %v287_v27 = vld [vmem:[%s3991_s1 + $0x70] sm:$0xff] }
  0x1a   : > { %2306 = vmatprep.subr.bf16.mxu0 %v2305_v0  ;;  %728 = vmatprep.mubr.f32.mxu0 %v178_v17  ;;  %v288_v28 = vld [vmem:[%s3991_s1 + $0x78] sm:$0xff]  ;;  %v319_v29 = vld [vmem:[%s3991_s1 + $0x170] sm:$0xff]  ;;  %v2345_v30 = vpack.c.bf16 %v336_v23, %v335_v22  ;;  %v353_v32 = vld [vmem:[%s3991_s1 + $0x280] sm:$0xff] }
  0x1b   : > { %2336 = vmatpush3.bf16.msra.mxu1 %v2335_v63  ;;  %v320_v31 = vld [vmem:[%s3991_s1 + $0x178] sm:$0xff]  ;;  %v354_v33 = vld [vmem:[%s3991_s1 + $0x288] sm:$0xff]  ;;  %v385_v34 = vld [vmem:[%s3991_s1 + $0x380] sm:$0xff]  ;;  %v2315_v36 = vpack.c.bf16 %v288_v28, %v287_v27 }
  0x1c   : > { %2338 = vmatprep.subr.bf16.mxu1 %v2337_v4  ;;  %v386_v35 = vld [vmem:[%s3991_s1 + $0x388] sm:$0xff]  ;;  %v2347_v37 = vpack.c.bf16 %v320_v31, %v319_v29  ;;  %v2349_v38 = vpack.c.bf16 %v354_v33, %v353_v32  ;;  %v337_v39 = vld [vmem:[%s3991_s1 + $0x200] sm:$0xff]  ;;  %v355_v44 = vld [vmem:[%s3991_s1 + $0x290] sm:$0xff] }
  0x1d   : > { %2308 = vmatpush3.bf16.msra.mxu0 %v2307_v10  ;;  %v338_v40 = vld [vmem:[%s3991_s1 + $0x208] sm:$0xff]  ;;  %v369_v41 = vld [vmem:[%s3991_s1 + $0x300] sm:$0xff]  ;;  %v2381_v42 = vpack.c.bf16 %v386_v35, %v385_v34  ;;  %v356_v45 = vld [vmem:[%s3991_s1 + $0x298] sm:$0xff] }
  0x1e   : > { %2310 = vmatprep.subr.bf16.mxu0 %v2309_v14  ;;  %v370_v43 = vld [vmem:[%s3991_s1 + $0x308] sm:$0xff]  ;;  %v387_v46 = vld [vmem:[%s3991_s1 + $0x390] sm:$0xff]  ;;  %v388_v47 = vld [vmem:[%s3991_s1 + $0x398] sm:$0xff]  ;;  %v2351_v49 = vpack.c.bf16 %v338_v40, %v337_v39  ;;  %v2353_v52 = vpack.c.bf16 %v356_v45, %v355_v44 }
  0x1f   : > { %2340 = vmatpush3.bf16.msra.mxu1 %v2339_v13  ;;  %v177_v48 = vld [vmem:[%s2876_s18] sm:$0xff]  ;;  %v179_v50 = vld [vmem:[%s2876_s18 + $0x10] sm:$0xff]  ;;  %v2383_v51 = vpack.c.bf16 %v370_v43, %v369_v41  ;;  %v340_v54 = vld [vmem:[%s3991_s1 + $0x218] sm:$0xff]  ;;  %v2385_v56 = vpack.c.bf16 %v388_v47, %v387_v46 }
  0x20   : > { %2342 = vmatprep.subr.bf16.mxu1 %v2341_v18  ;;  %v339_v53 = vld [vmem:[%s3991_s1 + $0x210] sm:$0xff]  ;;  %v372_v57 = vld [vmem:[%s3991_s1 + $0x318] sm:$0xff]  ;;  %v357_v58 = vld [vmem:[%s3991_s1 + $0x2a0] sm:$0xff] }
  0x21   : > { %2312 = vmatpush3.bf16.msra.mxu0 %v2311_v24  ;;  %v371_v55 = vld [vmem:[%s3991_s1 + $0x310] sm:$0xff]  ;;  %v358_v59 = vld [vmem:[%s3991_s1 + $0x2a8] sm:$0xff]  ;;  %v389_v60 = vld [vmem:[%s3991_s1 + $0x3a0] sm:$0xff]  ;;  %v2355_v62 = vpack.c.bf16 %v340_v54, %v339_v53 }
  0x22   : > { %2314 = vmatprep.subr.bf16.mxu0 %v2313_v26  ;;  %v390_v61 = vld [vmem:[%s3991_s1 + $0x3a8] sm:$0xff]  ;;  %v341_v63 = vld [vmem:[%s3991_s1 + $0x220] sm:$0xff]  ;;  %v2387_v2 = vpack.c.bf16 %v372_v57, %v371_v55  ;;  %v2357_v3 = vpack.c.bf16 %v358_v59, %v357_v58  ;;  %v204_v6 = vld [vmem:[%s2876_s18 + $0xd8] sm:$0xff] }
  0x23   : > { %2344 = vmatpush3.bf16.msra.mxu1 %v2343_v25  ;;  %v202_v0 = vld [vmem:[%s2876_s18 + $0xc8] sm:$0xff]  ;;  %v201_v1 = vld [vmem:[%s2876_s18 + $0xc0] sm:$0xff]  ;;  %v2389_v7 = vpack.c.bf16 %v390_v61, %v389_v60  ;;  %v359_v9 = vld [vmem:[%s3991_s1 + $0x2b0] sm:$0xff] }
  0x24   : > { %2346 = vmatprep.subr.bf16.mxu1 %v2345_v30  ;;  %v342_v4 = vld [vmem:[%s3991_s1 + $0x228] sm:$0xff]  ;;  %v373_v5 = vld [vmem:[%s3991_s1 + $0x320] sm:$0xff]  ;;  %v360_v10 = vld [vmem:[%s3991_s1 + $0x2b8] sm:$0xff] }
  0x25   : > { %2316 = vmatpush3.bf16.msra.mxu0 %v2315_v36  ;;  %v374_v8 = vld [vmem:[%s3991_s1 + $0x328] sm:$0xff]  ;;  %v391_v11 = vld [vmem:[%s3991_s1 + $0x3b0] sm:$0xff]  ;;  %v392_v12 = vld [vmem:[%s3991_s1 + $0x3b8] sm:$0xff]  ;;  %v2359_v14 = vpack.c.bf16 %v342_v4, %v341_v63  ;;  %v2361_v19 = vpack.c.bf16 %v360_v10, %v359_v9 }
  0x26   : > { %2350 = vmatprep.subr.bf16.mxu0 %v2349_v38  ;;  %v203_v13 = vld [vmem:[%s2876_s18 + $0xd0] sm:$0xff]  ;;  %v226_v16 = vld [vmem:[%s2876_s18 + $0x188] sm:$0xff]  ;;  %v225_v17 = vld [vmem:[%s2876_s18 + $0x180] sm:$0xff]  ;;  %v2391_v18 = vpack.c.bf16 %v374_v8, %v373_v5  ;;  %v2393_v23 = vpack.c.bf16 %v392_v12, %v391_v11 }
  0x27   : > { %2348 = vmatpush3.bf16.msra.mxu1 %v2347_v37  ;;  %v343_v15 = vld [vmem:[%s3991_s1 + $0x230] sm:$0xff]  ;;  %v344_v20 = vld [vmem:[%s3991_s1 + $0x238] sm:$0xff]  ;;  %v361_v25 = vld [vmem:[%s3991_s1 + $0x2c0] sm:$0xff] }
  0x28   : > { %2382 = vmatprep.subr.bf16.mxu1 %v2381_v42  ;;  %729 = vmatmul.mubr.f32.vlgmr.msra.gmra.mrb[0].mxu0 %v177_v48  ;;  %v375_v21 = vld [vmem:[%s3991_s1 + $0x330] sm:$0xff]  ;;  %v228_v22 = vld [vmem:[%s2876_s18 + $0x198] sm:$0xff]  ;;  %v362_v26 = vld [vmem:[%s3991_s1 + $0x2c8] sm:$0xff]  ;;  %v2363_v30 = vpack.c.bf16 %v344_v20, %v343_v15 }
  0x29   : > { %2352 = vmatpush3.bf16.msra.mxu0 %v2351_v49  ;;  %733 = vmatprep.mubr.f32.mxu0 %v202_v0  ;;  %v376_v24 = vld [vmem:[%s3991_s1 + $0x338] sm:$0xff]  ;;  %v393_v27 = vld [vmem:[%s3991_s1 + $0x3c0] sm:$0xff]  ;;  %v394_v28 = vld [vmem:[%s3991_s1 + $0x3c8] sm:$0xff]  ;;  %v2365_v35 = vpack.c.bf16 %v362_v26, %v361_v25 }
  0x2a   : > { %814 = vmatmul.mubr.f32.vlgmr.msra.gmra.mrb[0].mxu1 %v179_v50  ;;  %2354 = vmatprep.subr.bf16.mxu0 %v2353_v52  ;;  %v227_v29 = vld [vmem:[%s2876_s18 + $0x190] sm:$0xff]  ;;  %v345_v31 = vld [vmem:[%s3991_s1 + $0x240] sm:$0xff]  ;;  %v250_v32 = vld [vmem:[%s2876_s18 + $0x248] sm:$0xff]  ;;  %v2395_v34 = vpack.c.bf16 %v376_v24, %v375_v21  ;;  %v2397_v39 = vpack.c.bf16 %v394_v28, %v393_v27 }
  0x2b   : > { %2384 = vmatpush3.bf16.msra.mxu1 %v2383_v51  ;;  %818 = vmatprep.mubr.f32.mxu1 %v204_v6  ;;  %v249_v33 = vld [vmem:[%s2876_s18 + $0x240] sm:$0xff]  ;;  %v346_v36 = vld [vmem:[%s3991_s1 + $0x248] sm:$0xff]  ;;  %v252_v38 = vld [vmem:[%s2876_s18 + $0x258] sm:$0xff] }
  0x2c   : > { %2386 = vmatprep.subr.bf16.mxu1 %v2385_v56  ;;  %734 = vmatmul.mubr.f32.gmra.mrb[2].mxu0 %v201_v1  ;;  %v377_v37 = vld [vmem:[%s3991_s1 + $0x340] sm:$0xff]  ;;  %v378_v40 = vld [vmem:[%s3991_s1 + $0x348] sm:$0xff]  ;;  %v363_v41 = vld [vmem:[%s3991_s1 + $0x2d0] sm:$0xff]  ;;  %v2367_v46 = vpack.c.bf16 %v346_v36, %v345_v31 }
  0x2d   : > { %2356 = vmatpush3.bf16.msra.mxu0 %v2355_v62  ;;  %738 = vmatprep.mubr.f32.mxu0 %v226_v16  ;;  %v364_v42 = vld [vmem:[%s3991_s1 + $0x2d8] sm:$0xff]  ;;  %v395_v43 = vld [vmem:[%s3991_s1 + $0x3d0] sm:$0xff]  ;;  %v182_v48 = vld [vmem:[%s2876_s18 + $0x28] sm:$0xff]  ;;  %v2399_v49 = vpack.c.bf16 %v378_v40, %v377_v37 }
  0x2e   : > { %819 = vmatmul.mubr.f32.gmra.mrb[2].mxu1 %v203_v13  ;;  %2358 = vmatprep.subr.bf16.mxu0 %v2357_v3  ;;  %v396_v44 = vld [vmem:[%s3991_s1 + $0x3d8] sm:$0xff]  ;;  %v251_v45 = vld [vmem:[%s2876_s18 + $0x250] sm:$0xff]  ;;  %v2369_v50 = vpack.c.bf16 %v364_v42, %v363_v41  ;;  %v365_v56 = vld [vmem:[%s3991_s1 + $0x2e0] sm:$0xff] }
  0x2f   : > { %2388 = vmatpush3.bf16.msra.mxu1 %v2387_v2  ;;  %823 = vmatprep.mubr.f32.mxu1 %v228_v22  ;;  %v347_v47 = vld [vmem:[%s3991_s1 + $0x250] sm:$0xff]  ;;  %v348_v51 = vld [vmem:[%s3991_s1 + $0x258] sm:$0xff]  ;;  %v2401_v54 = vpack.c.bf16 %v396_v44, %v395_v43  ;;  %v366_v57 = vld [vmem:[%s3991_s1 + $0x2e8] sm:$0xff] }
  0x30   : > { %2390 = vmatprep.subr.bf16.mxu1 %v2389_v7  ;;  %739 = vmatmul.mubr.f32.gmra.mrb[4].mxu0 %v225_v17  ;;  %v379_v52 = vld [vmem:[%s3991_s1 + $0x350] sm:$0xff]  ;;  %v184_v53 = vld [vmem:[%s2876_s18 + $0x38] sm:$0xff]  ;;  %v397_v58 = vld [vmem:[%s3991_s1 + $0x3e0] sm:$0xff]  ;;  %v2371_v60 = vpack.c.bf16 %v348_v51, %v347_v47  ;;  %v2373_v62 = vpack.c.bf16 %v366_v57, %v365_v56 }
  0x31   : > { %2360 = vmatpush3.bf16.msra.mxu0 %v2359_v14  ;;  %743 = vmatprep.mubr.f32.mxu0 %v250_v32  ;;  %v380_v55 = vld [vmem:[%s3991_s1 + $0x358] sm:$0xff]  ;;  %v398_v59 = vld [vmem:[%s3991_s1 + $0x3e8] sm:$0xff]  ;;  %v349_v63 = vld [vmem:[%s3991_s1 + $0x260] sm:$0xff] }
  0x32   : > { %824 = vmatmul.mubr.f32.gmra.mrb[4].mxu1 %v227_v29  ;;  %2362 = vmatprep.subr.bf16.mxu0 %v2361_v19  ;;  %v2403_v61 = vpack.c.bf16 %v380_v55, %v379_v52  ;;  %v350_v0 = vld [vmem:[%s3991_s1 + $0x268] sm:$0xff]  ;;  %v381_v1 = vld [vmem:[%s3991_s1 + $0x360] sm:$0xff]  ;;  %v2405_v2 = vpack.c.bf16 %v398_v59, %v397_v58  ;;  %v367_v4 = vld [vmem:[%s3991_s1 + $0x2f0] sm:$0xff] }
  0x33   : > { %2392 = vmatpush3.bf16.msra.mxu1 %v2391_v18  ;;  %828 = vmatprep.mubr.f32.mxu1 %v252_v38  ;;  %v382_v3 = vld [vmem:[%s3991_s1 + $0x368] sm:$0xff]  ;;  %v368_v5 = vld [vmem:[%s3991_s1 + $0x2f8] sm:$0xff]  ;;  %v399_v6 = vld [vmem:[%s3991_s1 + $0x3f0] sm:$0xff]  ;;  %v2375_v8 = vpack.c.bf16 %v350_v0, %v349_v63 }
  0x34   : > { %2394 = vmatprep.subr.bf16.mxu1 %v2393_v23  ;;  %744 = vmatmul.mubr.f32.gmra.mrb[6].mxu0 %v249_v33  ;;  %v400_v7 = vld [vmem:[%s3991_s1 + $0x3f8] sm:$0xff]  ;;  %v2407_v9 = vpack.c.bf16 %v382_v3, %v381_v1  ;;  %v2377_v10 = vpack.c.bf16 %v368_v5, %v367_v4  ;;  %v351_v11 = vld [vmem:[%s3991_s1 + $0x270] sm:$0xff]  ;;  %v417_v16 = vld [vmem:[%s3991_s1 + $0x480] sm:$0xff] }
  0x35   : > { %2364 = vmatpush3.bf16.msra.mxu0 %v2363_v30  ;;  %898 = vmatprep.mubr.f32.mxu0 %v182_v48  ;;  %v352_v12 = vld [vmem:[%s3991_s1 + $0x278] sm:$0xff]  ;;  %v383_v13 = vld [vmem:[%s3991_s1 + $0x370] sm:$0xff]  ;;  %v2409_v14 = vpack.c.bf16 %v400_v7, %v399_v6  ;;  %v418_v17 = vld [vmem:[%s3991_s1 + $0x488] sm:$0xff] }
  0x36   : > { %829 = vmatmul.mubr.f32.gmra.mrb[6].mxu1 %v251_v45  ;;  %2366 = vmatprep.subr.bf16.mxu0 %v2365_v35  ;;  %v384_v15 = vld [vmem:[%s3991_s1 + $0x378] sm:$0xff]  ;;  %v449_v18 = vld [vmem:[%s3991_s1 + $0x580] sm:$0xff]  ;;  %v450_v19 = vld [vmem:[%s3991_s1 + $0x588] sm:$0xff]  ;;  %v2379_v20 = vpack.c.bf16 %v352_v12, %v351_v11  ;;  %v2413_v22 = vpack.c.bf16 %v418_v17, %v417_v16 }
  0x37   : > { %2396 = vmatpush3.bf16.msra.mxu1 %v2395_v34  ;;  %983 = vmatprep.mubr.f32.mxu1 %v184_v53  ;;  %v2411_v21 = vpack.c.bf16 %v384_v15, %v383_v13  ;;  %v401_v23 = vld [vmem:[%s3991_s1 + $0x400] sm:$0xff]  ;;  %v402_v24 = vld [vmem:[%s3991_s1 + $0x408] sm:$0xff]  ;;  %v2445_v25 = vpack.c.bf16 %v450_v19, %v449_v18  ;;  %v419_v29 = vld [vmem:[%s3991_s1 + $0x490] sm:$0xff] }
  0x38   : > { %2398 = vmatprep.subr.bf16.mxu1 %v2397_v39  ;;  %v433_v26 = vld [vmem:[%s3991_s1 + $0x500] sm:$0xff]  ;;  %v434_v27 = vld [vmem:[%s3991_s1 + $0x508] sm:$0xff]  ;;  %v420_v30 = vld [vmem:[%s3991_s1 + $0x498] sm:$0xff]  ;;  %v2415_v31 = vpack.c.bf16 %v402_v24, %v401_v23 }
  0x39   : > { %2368 = vmatpush3.bf16.msra.mxu0 %v2367_v46  ;;  %v181_v28 = vld [vmem:[%s2876_s18 + $0x20] sm:$0xff]  ;;  %v183_v32 = vld [vmem:[%s2876_s18 + $0x30] sm:$0xff]  ;;  %v452_v34 = vld [vmem:[%s3991_s1 + $0x598] sm:$0xff]  ;;  %v2447_v35 = vpack.c.bf16 %v434_v27, %v433_v26  ;;  %v2417_v40 = vpack.c.bf16 %v420_v30, %v419_v29 }
  0x3a   : > { %2370 = vmatprep.subr.bf16.mxu0 %v2369_v50  ;;  %v451_v33 = vld [vmem:[%s3991_s1 + $0x590] sm:$0xff]  ;;  %v206_v36 = vld [vmem:[%s2876_s18 + $0xe8] sm:$0xff]  ;;  %v404_v38 = vld [vmem:[%s3991_s1 + $0x418] sm:$0xff] }
  0x3b   : > { %2400 = vmatpush3.bf16.msra.mxu1 %v2399_v49  ;;  %v403_v37 = vld [vmem:[%s3991_s1 + $0x410] sm:$0xff]  ;;  %v205_v39 = vld [vmem:[%s2876_s18 + $0xe0] sm:$0xff]  ;;  %v436_v42 = vld [vmem:[%s3991_s1 + $0x518] sm:$0xff]  ;;  %v2449_v44 = vpack.c.bf16 %v452_v34, %v451_v33 }
  0x3c   : > { %2402 = vmatprep.subr.bf16.mxu1 %v2401_v54  ;;  %v435_v41 = vld [vmem:[%s3991_s1 + $0x510] sm:$0xff]  ;;  %v208_v43 = vld [vmem:[%s2876_s18 + $0xf8] sm:$0xff]  ;;  %v421_v45 = vld [vmem:[%s3991_s1 + $0x4a0] sm:$0xff]  ;;  %v2419_v47 = vpack.c.bf16 %v404_v38, %v403_v37 }
  0x3d   : > { %2372 = vmatpush3.bf16.msra.mxu0 %v2371_v60  ;;  %v422_v46 = vld [vmem:[%s3991_s1 + $0x4a8] sm:$0xff]  ;;  %v207_v48 = vld [vmem:[%s2876_s18 + $0xf0] sm:$0xff]  ;;  %v453_v49 = vld [vmem:[%s3991_s1 + $0x5a0] sm:$0xff]  ;;  %v2451_v51 = vpack.c.bf16 %v436_v42, %v435_v41 }
  0x3e   : > { %2374 = vmatprep.subr.bf16.mxu0 %v2373_v62  ;;  %v454_v50 = vld [vmem:[%s3991_s1 + $0x5a8] sm:$0xff]  ;;  %v405_v53 = vld [vmem:[%s3991_s1 + $0x420] sm:$0xff]  ;;  %v2421_v56 = vpack.c.bf16 %v422_v46, %v421_v45  ;;  %v232_v57 = vld [vmem:[%s2876_s18 + $0x1b8] sm:$0xff] }
  0x3f   : > { %2404 = vmatpush3.bf16.msra.mxu1 %v2403_v61  ;;  %v230_v52 = vld [vmem:[%s2876_s18 + $0x1a8] sm:$0xff]  ;;  %v229_v55 = vld [vmem:[%s2876_s18 + $0x1a0] sm:$0xff]  ;;  %v2453_v60 = vpack.c.bf16 %v454_v50, %v453_v49  ;;  %v231_v61 = vld [vmem:[%s2876_s18 + $0x1b0] sm:$0xff] }
  0x40   : > { %2406 = vmatprep.subr.bf16.mxu1 %v2405_v2  ;;  %v406_v54 = vld [vmem:[%s3991_s1 + $0x428] sm:$0xff]  ;;  %v437_v58 = vld [vmem:[%s3991_s1 + $0x520] sm:$0xff]  ;;  %v423_v62 = vld [vmem:[%s3991_s1 + $0x4b0] sm:$0xff] }
  0x41   : > { %2376 = vmatpush3.bf16.msra.mxu0 %v2375_v8  ;;  %v438_v59 = vld [vmem:[%s3991_s1 + $0x528] sm:$0xff]  ;;  %v424_v63 = vld [vmem:[%s3991_s1 + $0x4b8] sm:$0xff]  ;;  %v2423_v0 = vpack.c.bf16 %v406_v54, %v405_v53  ;;  %v455_v2 = vld [vmem:[%s3991_s1 + $0x5b0] sm:$0xff] }
  0x42   : > { %2378 = vmatprep.subr.bf16.mxu0 %v2377_v10  ;;  %v254_v1 = vld [vmem:[%s2876_s18 + $0x268] sm:$0xff]  ;;  %v456_v3 = vld [vmem:[%s3991_s1 + $0x5b8] sm:$0xff]  ;;  %v2455_v4 = vpack.c.bf16 %v438_v59, %v437_v58  ;;  %v407_v5 = vld [vmem:[%s3991_s1 + $0x430] sm:$0xff]  ;;  %v2425_v8 = vpack.c.bf16 %v424_v63, %v423_v62 }
  0x43   : > { %2408 = vmatpush3.bf16.msra.mxu1 %v2407_v9  ;;  %v408_v6 = vld [vmem:[%s3991_s1 + $0x438] sm:$0xff]  ;;  %v439_v7 = vld [vmem:[%s3991_s1 + $0x530] sm:$0xff]  ;;  %v425_v10 = vld [vmem:[%s3991_s1 + $0x4c0] sm:$0xff]  ;;  %v2457_v13 = vpack.c.bf16 %v456_v3, %v455_v2 }
  0x44   : > { %2410 = vmatprep.subr.bf16.mxu1 %v2409_v14  ;;  %v440_v9 = vld [vmem:[%s3991_s1 + $0x538] sm:$0xff]  ;;  %v426_v11 = vld [vmem:[%s3991_s1 + $0x4c8] sm:$0xff]  ;;  %v457_v14 = vld [vmem:[%s3991_s1 + $0x5c0] sm:$0xff]  ;;  %v2427_v17 = vpack.c.bf16 %v408_v6, %v407_v5 }
  0x45   : > { %2380 = vmatpush3.bf16.msra.mxu0 %v2379_v20  ;;  %v256_v12 = vld [vmem:[%s2876_s18 + $0x278] sm:$0xff]  ;;  %v458_v15 = vld [vmem:[%s3991_s1 + $0x5c8] sm:$0xff]  ;;  %v253_v16 = vld [vmem:[%s2876_s18 + $0x260] sm:$0xff]  ;;  %v2459_v19 = vpack.c.bf16 %v440_v9, %v439_v7  ;;  %v2429_v20 = vpack.c.bf16 %v426_v11, %v425_v10 }
  0x46   : > { %2414 = vmatprep.subr.bf16.mxu0 %v2413_v22  ;;  %v255_v18 = vld [vmem:[%s2876_s18 + $0x270] sm:$0xff]  ;;  %v410_v22 = vld [vmem:[%s3991_s1 + $0x448] sm:$0xff]  ;;  %v441_v23 = vld [vmem:[%s3991_s1 + $0x540] sm:$0xff]  ;;  %v2461_v24 = vpack.c.bf16 %v458_v15, %v457_v14 }
  0x47   : > { %2412 = vmatpush3.bf16.msra.mxu1 %v2411_v21  ;;  %v409_v21 = vld [vmem:[%s3991_s1 + $0x440] sm:$0xff]  ;;  %v427_v26 = vld [vmem:[%s3991_s1 + $0x4d0] sm:$0xff]  ;;  %v428_v27 = vld [vmem:[%s3991_s1 + $0x4d8] sm:$0xff] }
  0x48   : > { %2446 = vmatprep.subr.bf16.mxu1 %v2445_v25  ;;  %899 = vmatmul.mubr.f32.vlgmr.msra.gmra.mrb[8].mxu0 %v181_v28  ;;  %v442_v25 = vld [vmem:[%s3991_s1 + $0x548] sm:$0xff]  ;;  %v459_v28 = vld [vmem:[%s3991_s1 + $0x5d0] sm:$0xff]  ;;  %v460_v29 = vld [vmem:[%s3991_s1 + $0x5d8] sm:$0xff]  ;;  %v2433_v34 = vpack.c.bf16 %v428_v27, %v427_v26 }
  0x49   : > { %2416 = vmatpush3.bf16.msra.mxu0 %v2415_v31  ;;  %903 = vmatprep.mubr.f32.mxu0 %v206_v36  ;;  %v186_v30 = vld [vmem:[%s2876_s18 + $0x48] sm:$0xff]  ;;  %v2431_v31 = vpack.c.bf16 %v410_v22, %v409_v21  ;;  %v2463_v33 = vpack.c.bf16 %v442_v25, %v441_v23  ;;  %v412_v36 = vld [vmem:[%s3991_s1 + $0x458] sm:$0xff]  ;;  %v443_v37 = vld [vmem:[%s3991_s1 + $0x550] sm:$0xff]  ;;  %v2465_v38 = vpack.c.bf16 %v460_v29, %v459_v28 }
  0x4a   : > { %984 = vmatmul.mubr.f32.vlgmr.msra.gmra.mrb[8].mxu1 %v183_v32  ;;  %2418 = vmatprep.subr.bf16.mxu0 %v2417_v40  ;;  %v188_v32 = vld [vmem:[%s2876_s18 + $0x58] sm:$0xff]  ;;  %v429_v40 = vld [vmem:[%s3991_s1 + $0x4e0] sm:$0xff]  ;;  %v430_v41 = vld [vmem:[%s3991_s1 + $0x4e8] sm:$0xff] }
  0x4b   : > { %2448 = vmatpush3.bf16.msra.mxu1 %v2447_v35  ;;  %988 = vmatprep.mubr.f32.mxu1 %v208_v43  ;;  %v411_v35 = vld [vmem:[%s3991_s1 + $0x450] sm:$0xff]  ;;  %v461_v42 = vld [vmem:[%s3991_s1 + $0x5e0] sm:$0xff]  ;;  %v462_v43 = vld [vmem:[%s3991_s1 + $0x5e8] sm:$0xff]  ;;  %v2437_v46 = vpack.c.bf16 %v430_v41, %v429_v40 }
  0x4c   : > { %904 = vmatmul.mubr.f32.gmra.mrb[10].mxu0 %v205_v39  ;;  %2450 = vmatprep.subr.bf16.mxu1 %v2449_v44  ;;  %v444_v39 = vld [vmem:[%s3991_s1 + $0x558] sm:$0xff]  ;;  %v2435_v44 = vpack.c.bf16 %v412_v36, %v411_v35  ;;  %v445_v49 = vld [vmem:[%s3991_s1 + $0x560] sm:$0xff]  ;;  %v2469_v50 = vpack.c.bf16 %v462_v43, %v461_v42  ;;  %v463_v54 = vld [vmem:[%s3991_s1 + $0x5f0] sm:$0xff] }
  0x4d   : > { %2420 = vmatpush3.bf16.msra.mxu0 %v2419_v47  ;;  %908 = vmatprep.mubr.f32.mxu0 %v230_v52  ;;  %v2467_v45 = vpack.c.bf16 %v444_v39, %v443_v37  ;;  %v413_v47 = vld [vmem:[%s3991_s1 + $0x460] sm:$0xff]  ;;  %v431_v52 = vld [vmem:[%s3991_s1 + $0x4f0] sm:$0xff]  ;;  %v432_v53 = vld [vmem:[%s3991_s1 + $0x4f8] sm:$0xff] }
  0x4e   : > { %989 = vmatmul.mubr.f32.gmra.mrb[10].mxu1 %v207_v48  ;;  %2422 = vmatprep.subr.bf16.mxu0 %v2421_v56  ;;  %v414_v48 = vld [vmem:[%s3991_s1 + $0x468] sm:$0xff]  ;;  %v2441_v58 = vpack.c.bf16 %v432_v53, %v431_v52  ;;  %v415_v59 = vld [vmem:[%s3991_s1 + $0x470] sm:$0xff]  ;;  %v448_v63 = vld [vmem:[%s3991_s1 + $0x578] sm:$0xff] }
  0x4f   : > { %2452 = vmatpush3.bf16.msra.mxu1 %v2451_v51  ;;  %993 = vmatprep.mubr.f32.mxu1 %v232_v57  ;;  %v446_v51 = vld [vmem:[%s3991_s1 + $0x568] sm:$0xff]  ;;  %v2439_v56 = vpack.c.bf16 %v414_v48, %v413_v47  ;;  %v513_v2 = vld [vmem:[%s3991_s1 + $0x780] sm:$0xff]  ;;  %v484_v14 = vld [vmem:[%s3991_s1 + $0x698] sm:$0xff] }
  0x50   : > { %909 = vmatmul.mubr.f32.gmra.mrb[12].mxu0 %v229_v55  ;;  %2454 = vmatprep.subr.bf16.mxu1 %v2453_v60  ;;  %v464_v55 = vld [vmem:[%s3991_s1 + $0x5f8] sm:$0xff]  ;;  %v2471_v57 = vpack.c.bf16 %v446_v51, %v445_v49  ;;  %v514_v3 = vld [vmem:[%s3991_s1 + $0x788] sm:$0xff]  ;;  %v465_v7 = vld [vmem:[%s3991_s1 + $0x600] sm:$0xff] }
  0x51   : > { %2424 = vmatpush3.bf16.msra.mxu0 %v2423_v0  ;;  %913 = vmatprep.mubr.f32.mxu0 %v254_v1  ;;  %v416_v60 = vld [vmem:[%s3991_s1 + $0x478] sm:$0xff]  ;;  %v2473_v62 = vpack.c.bf16 %v464_v55, %v463_v54  ;;  %v481_v0 = vld [vmem:[%s3991_s1 + $0x680] sm:$0xff]  ;;  %v482_v1 = vld [vmem:[%s3991_s1 + $0x688] sm:$0xff]  ;;  %v2509_v9 = vpack.c.bf16 %v514_v3, %v513_v2 }
  0x52   : > { %994 = vmatmul.mubr.f32.gmra.mrb[12].mxu1 %v231_v61  ;;  %2426 = vmatprep.subr.bf16.mxu0 %v2425_v8  ;;  %v447_v61 = vld [vmem:[%s3991_s1 + $0x570] sm:$0xff]  ;;  %v2477_v6 = vpack.c.bf16 %v482_v1, %v481_v0  ;;  %v466_v8 = vld [vmem:[%s3991_s1 + $0x608] sm:$0xff]  ;;  %v497_v10 = vld [vmem:[%s3991_s1 + $0x700] sm:$0xff] }
  0x53   : > { %2456 = vmatpush3.bf16.msra.mxu1 %v2455_v4  ;;  %998 = vmatprep.mubr.f32.mxu1 %v256_v12  ;;  %v2443_v4 = vpack.c.bf16 %v416_v60, %v415_v59  ;;  %v2475_v5 = vpack.c.bf16 %v448_v63, %v447_v61  ;;  %v498_v11 = vld [vmem:[%s3991_s1 + $0x708] sm:$0xff]  ;;  %v185_v12 = vld [vmem:[%s2876_s18 + $0x40] sm:$0xff]  ;;  %v2479_v15 = vpack.c.bf16 %v466_v8, %v465_v7  ;;  %v467_v21 = vld [vmem:[%s3991_s1 + $0x610] sm:$0xff] }
  0x54   : > { %914 = vmatmul.mubr.f32.gmra.mrb[14].mxu0 %v253_v16  ;;  %2458 = vmatprep.subr.bf16.mxu1 %v2457_v13  ;;  %v483_v13 = vld [vmem:[%s3991_s1 + $0x690] sm:$0xff]  ;;  %v468_v22 = vld [vmem:[%s3991_s1 + $0x618] sm:$0xff]  ;;  %v209_v23 = vld [vmem:[%s2876_s18 + $0x100] sm:$0xff] }
  0x55   : > { %2428 = vmatpush3.bf16.msra.mxu0 %v2427_v17  ;;  %1068 = vmatprep.mubr.f32.mxu0 %v186_v30  ;;  %v187_v16 = vld [vmem:[%s2876_s18 + $0x50] sm:$0xff]  ;;  %v500_v26 = vld [vmem:[%s3991_s1 + $0x718] sm:$0xff]  ;;  %v485_v29 = vld [vmem:[%s3991_s1 + $0x6a0] sm:$0xff] }
  0x56   : > { %999 = vmatmul.mubr.f32.gmra.mrb[14].mxu1 %v255_v18  ;;  %2430 = vmatprep.subr.bf16.mxu0 %v2429_v20  ;;  %v515_v17 = vld [vmem:[%s3991_s1 + $0x790] sm:$0xff]  ;;  %v516_v18 = vld [vmem:[%s3991_s1 + $0x798] sm:$0xff]  ;;  %v210_v20 = vld [vmem:[%s2876_s18 + $0x108] sm:$0xff] }
  0x57   : > { %2460 = vmatpush3.bf16.msra.mxu1 %v2459_v19  ;;  %1153 = vmatprep.mubr.f32.mxu1 %v188_v32  ;;  %v2511_v19 = vpack.c.bf16 %v498_v11, %v497_v10  ;;  %v499_v25 = vld [vmem:[%s3991_s1 + $0x710] sm:$0xff]  ;;  %v212_v27 = vld [vmem:[%s2876_s18 + $0x118] sm:$0xff]  ;;  %v2513_v28 = vpack.c.bf16 %v516_v18, %v515_v17  ;;  %v486_v30 = vld [vmem:[%s3991_s1 + $0x6a8] sm:$0xff] }
  0x58   : > { %2462 = vmatprep.subr.bf16.mxu1 %v2461_v24  ;;  %v2481_v24 = vpack.c.bf16 %v484_v14, %v483_v13  ;;  %v211_v32 = vld [vmem:[%s2876_s18 + $0x110] sm:$0xff]  ;;  %v2515_v35 = vpack.c.bf16 %v500_v26, %v499_v25  ;;  %v234_v36 = vld [vmem:[%s2876_s18 + $0x1c8] sm:$0xff]  ;;  %v469_v37 = vld [vmem:[%s3991_s1 + $0x620] sm:$0xff]  ;;  %v2485_v40 = vpack.c.bf16 %v486_v30, %v485_v29 }
  0x59   : > { %2432 = vmatpush3.bf16.msra.mxu0 %v2431_v31  ;;  %v2483_v31 = vpack.c.bf16 %v468_v22, %v467_v21  ;;  %v233_v39 = vld [vmem:[%s2876_s18 + $0x1c0] sm:$0xff]  ;;  %v236_v41 = vld [vmem:[%s2876_s18 + $0x1d8] sm:$0xff]  ;;  %v502_v43 = vld [vmem:[%s3991_s1 + $0x728] sm:$0xff] }
  0x5a   : > { %2434 = vmatprep.subr.bf16.mxu0 %v2433_v34  ;;  %v518_v34 = vld [vmem:[%s3991_s1 + $0x7a8] sm:$0xff]  ;;  %v501_v42 = vld [vmem:[%s3991_s1 + $0x720] sm:$0xff]  ;;  %v488_v47 = vld [vmem:[%s3991_s1 + $0x6b8] sm:$0xff] }
  0x5b   : > { %2464 = vmatpush3.bf16.msra.mxu1 %v2463_v33  ;;  %v517_v33 = vld [vmem:[%s3991_s1 + $0x7a0] sm:$0xff]  ;;  %v258_v49 = vld [vmem:[%s2876_s18 + $0x288] sm:$0xff]  ;;  %v520_v51 = vld [vmem:[%s3991_s1 + $0x7b8] sm:$0xff]  ;;  %v2519_v52 = vpack.c.bf16 %v502_v43, %v501_v42 }
  0x5c   : > { %2466 = vmatprep.subr.bf16.mxu1 %v2465_v38  ;;  %v470_v38 = vld [vmem:[%s3991_s1 + $0x628] sm:$0xff]  ;;  %v471_v53 = vld [vmem:[%s3991_s1 + $0x630] sm:$0xff]  ;;  %v472_v54 = vld [vmem:[%s3991_s1 + $0x638] sm:$0xff] }
  0x5d   : > { %2436 = vmatpush3.bf16.msra.mxu0 %v2435_v44  ;;  %v2517_v44 = vpack.c.bf16 %v518_v34, %v517_v33  ;;  %v2487_v48 = vpack.c.bf16 %v470_v38, %v469_v37  ;;  %v503_v55 = vld [vmem:[%s3991_s1 + $0x730] sm:$0xff]  ;;  %v490_v59 = vld [vmem:[%s3991_s1 + $0x6c8] sm:$0xff]  ;;  %v260_v60 = vld [vmem:[%s2876_s18 + $0x298] sm:$0xff]  ;;  %v2491_v1 = vpack.c.bf16 %v472_v54, %v471_v53 }
  0x5e   : > { %2438 = vmatprep.subr.bf16.mxu0 %v2437_v46  ;;  %v487_v46 = vld [vmem:[%s3991_s1 + $0x6b0] sm:$0xff]  ;;  %v522_v63 = vld [vmem:[%s3991_s1 + $0x7c8] sm:$0xff]  ;;  %v257_v0 = vld [vmem:[%s2876_s18 + $0x280] sm:$0xff] }
  0x5f   : > { %2468 = vmatpush3.bf16.msra.mxu1 %v2467_v45  ;;  %v235_v45 = vld [vmem:[%s2876_s18 + $0x1d0] sm:$0xff]  ;;  %v505_v7 = vld [vmem:[%s3991_s1 + $0x740] sm:$0xff]  ;;  %v492_v11 = vld [vmem:[%s3991_s1 + $0x6d8] sm:$0xff] }
  0x60   : > { %2470 = vmatprep.subr.bf16.mxu1 %v2469_v50  ;;  %v519_v50 = vld [vmem:[%s3991_s1 + $0x7b0] sm:$0xff]  ;;  %v524_v13 = vld [vmem:[%s3991_s1 + $0x7d8] sm:$0xff]  ;;  %v190_v14 = vld [vmem:[%s2876_s18 + $0x68] sm:$0xff] }
  0x61   : > { %2440 = vmatpush3.bf16.msra.mxu0 %v2439_v56  ;;  %v2489_v56 = vpack.c.bf16 %v488_v47, %v487_v46  ;;  %v2521_v61 = vpack.c.bf16 %v520_v51, %v519_v50  ;;  %v259_v2 = vld [vmem:[%s2876_s18 + $0x290] sm:$0xff]  ;;  %v494_v25 = vld [vmem:[%s3991_s1 + $0x6e8] sm:$0xff]  ;;  %v525_v26 = vld [vmem:[%s3991_s1 + $0x7e0] sm:$0xff] }
  0x62   : > { %2442 = vmatprep.subr.bf16.mxu0 %v2441_v58  ;;  %v489_v58 = vld [vmem:[%s3991_s1 + $0x6c0] sm:$0xff]  ;;  %v491_v10 = vld [vmem:[%s3991_s1 + $0x6d0] sm:$0xff]  ;;  %v496_v37 = vld [vmem:[%s3991_s1 + $0x6f8] sm:$0xff] }
  0x63   : > { %2472 = vmatpush3.bf16.msra.mxu1 %v2471_v57  ;;  %v504_v57 = vld [vmem:[%s3991_s1 + $0x738] sm:$0xff]  ;;  %v2497_v18 = vpack.c.bf16 %v492_v11, %v491_v10  ;;  %v507_v21 = vld [vmem:[%s3991_s1 + $0x750] sm:$0xff]  ;;  %v509_v33 = vld [vmem:[%s3991_s1 + $0x760] sm:$0xff] }
  0x64   : > { %2474 = vmatprep.subr.bf16.mxu1 %v2473_v62  ;;  %v521_v62 = vld [vmem:[%s3991_s1 + $0x7c0] sm:$0xff]  ;;  %v2523_v3 = vpack.c.bf16 %v504_v57, %v503_v55  ;;  %v527_v38 = vld [vmem:[%s3991_s1 + $0x7f0] sm:$0xff]  ;;  %v512_v47 = vld [vmem:[%s3991_s1 + $0x778] sm:$0xff] }
  0x65   : > { %2444 = vmatpush3.bf16.msra.mxu0 %v2443_v4  ;;  %v2493_v4 = vpack.c.bf16 %v490_v59, %v489_v58  ;;  %v2525_v8 = vpack.c.bf16 %v522_v63, %v521_v62  ;;  %v479_v43 = vld [vmem:[%s3991_s1 + $0x670] sm:$0xff]  ;;  %v577_v50 = vld [vmem:[%s3991_s1 + $0x980] sm:$0xff]  ;;  %v578_v51 = vld [vmem:[%s3991_s1 + $0x988] sm:$0xff] }
  0x66   : > { %2478 = vmatprep.subr.bf16.mxu0 %v2477_v6  ;;  %v474_v6 = vld [vmem:[%s3991_s1 + $0x648] sm:$0xff]  ;;  %v529_v55 = vld [vmem:[%s3991_s1 + $0x800] sm:$0xff]  ;;  %v2573_v57 = vpack.c.bf16 %v578_v51, %v577_v50  ;;  %v548_v62 = vld [vmem:[%s3991_s1 + $0x898] sm:$0xff] }
  0x67   : > { %2476 = vmatpush3.bf16.msra.mxu1 %v2475_v5  ;;  %v473_v5 = vld [vmem:[%s3991_s1 + $0x640] sm:$0xff]  ;;  %v562_v59 = vld [vmem:[%s3991_s1 + $0x908] sm:$0xff]  ;;  %v564_v10 = vld [vmem:[%s3991_s1 + $0x918] sm:$0xff] }
  0x68   : > { %2510 = vmatprep.subr.bf16.mxu1 %v2509_v9  ;;  %1069 = vmatmul.mubr.f32.vlgmr.msra.gmra.mrb[16].mxu0 %v185_v12  ;;  %v506_v9 = vld [vmem:[%s3991_s1 + $0x748] sm:$0xff]  ;;  %v523_v12 = vld [vmem:[%s3991_s1 + $0x7d0] sm:$0xff]  ;;  %v561_v58 = vld [vmem:[%s3991_s1 + $0x900] sm:$0xff] }
  0x69   : > { %2480 = vmatpush3.bf16.msra.mxu0 %v2479_v15  ;;  %1073 = vmatprep.mubr.f32.mxu0 %v210_v20  ;;  %v2495_v15 = vpack.c.bf16 %v474_v6, %v473_v5  ;;  %v2527_v17 = vpack.c.bf16 %v506_v9, %v505_v7  ;;  %v476_v20 = vld [vmem:[%s3991_s1 + $0x658] sm:$0xff]  ;;  %v2529_v22 = vpack.c.bf16 %v524_v13, %v523_v12  ;;  %v531_v5 = vld [vmem:[%s3991_s1 + $0x810] sm:$0xff]  ;;  %v213_v7 = vld [vmem:[%s2876_s18 + $0x120] sm:$0xff] }
  0x6a   : > { %1154 = vmatmul.mubr.f32.vlgmr.msra.gmra.mrb[16].mxu1 %v187_v16  ;;  %2482 = vmatprep.subr.bf16.mxu0 %v2481_v24  ;;  %v192_v16 = vld [vmem:[%s2876_s18 + $0x78] sm:$0xff]  ;;  %v493_v24 = vld [vmem:[%s3991_s1 + $0x6e0] sm:$0xff]  ;;  %v563_v9 = vld [vmem:[%s3991_s1 + $0x910] sm:$0xff] }
  0x6b   : > { %2512 = vmatpush3.bf16.msra.mxu1 %v2511_v19  ;;  %1158 = vmatprep.mubr.f32.mxu1 %v212_v27  ;;  %v475_v19 = vld [vmem:[%s3991_s1 + $0x650] sm:$0xff]  ;;  %v526_v27 = vld [vmem:[%s3991_s1 + $0x7e8] sm:$0xff]  ;;  %v2501_v30 = vpack.c.bf16 %v494_v25, %v493_v24  ;;  %v532_v6 = vld [vmem:[%s3991_s1 + $0x818] sm:$0xff] }
  0x6c   : > { %1074 = vmatmul.mubr.f32.gmra.mrb[18].mxu0 %v209_v23  ;;  %2514 = vmatprep.subr.bf16.mxu1 %v2513_v28  ;;  %v508_v23 = vld [vmem:[%s3991_s1 + $0x758] sm:$0xff]  ;;  %v2499_v28 = vpack.c.bf16 %v476_v20, %v475_v19  ;;  %v2533_v34 = vpack.c.bf16 %v526_v27, %v525_v26  ;;  %v549_v13 = vld [vmem:[%s3991_s1 + $0x8a0] sm:$0xff]  ;;  %v2579_v19 = vpack.c.bf16 %v564_v10, %v563_v9  ;;  %v238_v20 = vld [vmem:[%s2876_s18 + $0x1e8] sm:$0xff] }
  0x6d   : > { %2484 = vmatpush3.bf16.msra.mxu0 %v2483_v31  ;;  %1078 = vmatprep.mubr.f32.mxu0 %v234_v36  ;;  %v2531_v29 = vpack.c.bf16 %v508_v23, %v507_v21  ;;  %v477_v31 = vld [vmem:[%s3991_s1 + $0x660] sm:$0xff]  ;;  %v495_v36 = vld [vmem:[%s3991_s1 + $0x6f0] sm:$0xff]  ;;  %v216_v11 = vld [vmem:[%s2876_s18 + $0x138] sm:$0xff] }
  0x6e   : > { %1159 = vmatmul.mubr.f32.gmra.mrb[18].mxu1 %v211_v32  ;;  %2486 = vmatprep.subr.bf16.mxu0 %v2485_v40  ;;  %v478_v32 = vld [vmem:[%s3991_s1 + $0x668] sm:$0xff]  ;;  %v2505_v42 = vpack.c.bf16 %v496_v37, %v495_v36  ;;  %v533_v21 = vld [vmem:[%s3991_s1 + $0x820] sm:$0xff]  ;;  %v240_v25 = vld [vmem:[%s2876_s18 + $0x1f8] sm:$0xff] }
  0x6f   : > { %2516 = vmatpush3.bf16.msra.mxu1 %v2515_v35  ;;  %1163 = vmatprep.mubr.f32.mxu1 %v236_v41  ;;  %v510_v35 = vld [vmem:[%s3991_s1 + $0x768] sm:$0xff]  ;;  %v2503_v40 = vpack.c.bf16 %v478_v32, %v477_v31  ;;  %v237_v23 = vld [vmem:[%s2876_s18 + $0x1e0] sm:$0xff]  ;;  %v552_v31 = vld [vmem:[%s3991_s1 + $0x8b8] sm:$0xff] }
  0x70   : > { %1079 = vmatmul.mubr.f32.gmra.mrb[20].mxu0 %v233_v39  ;;  %2518 = vmatprep.subr.bf16.mxu1 %v2517_v44  ;;  %v528_v39 = vld [vmem:[%s3991_s1 + $0x7f8] sm:$0xff]  ;;  %v2535_v41 = vpack.c.bf16 %v510_v35, %v509_v33  ;;  %v565_v26 = vld [vmem:[%s3991_s1 + $0x920] sm:$0xff]  ;;  %v566_v27 = vld [vmem:[%s3991_s1 + $0x928] sm:$0xff] }
  0x71   : > { %2488 = vmatpush3.bf16.msra.mxu0 %v2487_v48  ;;  %1083 = vmatprep.mubr.f32.mxu0 %v258_v49  ;;  %v480_v44 = vld [vmem:[%s3991_s1 + $0x678] sm:$0xff]  ;;  %v2537_v46 = vpack.c.bf16 %v528_v39, %v527_v38  ;;  %v545_v48 = vld [vmem:[%s3991_s1 + $0x880] sm:$0xff]  ;;  %v546_v49 = vld [vmem:[%s3991_s1 + $0x888] sm:$0xff]  ;;  %v2583_v36 = vpack.c.bf16 %v566_v27, %v565_v26 }
  0x72   : > { %1164 = vmatmul.mubr.f32.gmra.mrb[20].mxu1 %v235_v45  ;;  %2490 = vmatprep.subr.bf16.mxu0 %v2489_v56  ;;  %v511_v45 = vld [vmem:[%s3991_s1 + $0x770] sm:$0xff]  ;;  %v2541_v54 = vpack.c.bf16 %v546_v49, %v545_v48  ;;  %v530_v56 = vld [vmem:[%s3991_s1 + $0x808] sm:$0xff]  ;;  %v584_v35 = vld [vmem:[%s3991_s1 + $0x9b8] sm:$0xff] }
  0x73   : > { %2520 = vmatpush3.bf16.msra.mxu1 %v2519_v52  ;;  %1168 = vmatprep.mubr.f32.mxu1 %v260_v60  ;;  %v2507_v52 = vpack.c.bf16 %v480_v44, %v479_v43  ;;  %v2539_v53 = vpack.c.bf16 %v512_v47, %v511_v45  ;;  %v189_v60 = vld [vmem:[%s2876_s18 + $0x60] sm:$0xff]  ;;  %v2543_v63 = vpack.c.bf16 %v530_v56, %v529_v55  ;;  %v262_v33 = vld [vmem:[%s2876_s18 + $0x2a8] sm:$0xff]  ;;  %v535_v37 = vld [vmem:[%s3991_s1 + $0x830] sm:$0xff] }
  0x74   : > { %1084 = vmatmul.mubr.f32.gmra.mrb[22].mxu0 %v257_v0  ;;  %2522 = vmatprep.subr.bf16.mxu1 %v2521_v61  ;;  %v547_v61 = vld [vmem:[%s3991_s1 + $0x890] sm:$0xff]  ;;  %v536_v38 = vld [vmem:[%s3991_s1 + $0x838] sm:$0xff]  ;;  %v554_v43 = vld [vmem:[%s3991_s1 + $0x8c8] sm:$0xff] }
  0x75   : > { %2492 = vmatpush3.bf16.msra.mxu0 %v2491_v1  ;;  %1238 = vmatprep.mubr.f32.mxu0 %v190_v14  ;;  %v191_v0 = vld [vmem:[%s2876_s18 + $0x70] sm:$0xff]  ;;  %v550_v14 = vld [vmem:[%s3991_s1 + $0x8a8] sm:$0xff]  ;;  %v264_v44 = vld [vmem:[%s2876_s18 + $0x2b8] sm:$0xff]  ;;  %v2555_v49 = vpack.c.bf16 %v536_v38, %v535_v37 }
  0x76   : > { %1169 = vmatmul.mubr.f32.gmra.mrb[22].mxu1 %v259_v2  ;;  %2494 = vmatprep.subr.bf16.mxu0 %v2493_v4  ;;  %v579_v1 = vld [vmem:[%s3991_s1 + $0x990] sm:$0xff]  ;;  %v580_v2 = vld [vmem:[%s3991_s1 + $0x998] sm:$0xff]  ;;  %v214_v4 = vld [vmem:[%s2876_s18 + $0x128] sm:$0xff]  ;;  %v2549_v24 = vpack.c.bf16 %v550_v14, %v549_v13 }
  0x77   : > { %2524 = vmatpush3.bf16.msra.mxu1 %v2523_v3  ;;  %1323 = vmatprep.mubr.f32.mxu1 %v192_v16  ;;  %v2575_v3 = vpack.c.bf16 %v562_v59, %v561_v58  ;;  %v2577_v12 = vpack.c.bf16 %v580_v2, %v579_v1  ;;  %v215_v16 = vld [vmem:[%s2876_s18 + $0x130] sm:$0xff]  ;;  %v586_v47 = vld [vmem:[%s3991_s1 + $0x9c8] sm:$0xff]  ;;  %v261_v48 = vld [vmem:[%s2876_s18 + $0x2a0] sm:$0xff] }
  0x78   : > { %2526 = vmatprep.subr.bf16.mxu1 %v2525_v8  ;;  %v2545_v8 = vpack.c.bf16 %v548_v62, %v547_v61  ;;  %v567_v39 = vld [vmem:[%s3991_s1 + $0x930] sm:$0xff]  ;;  %v569_v55 = vld [vmem:[%s3991_s1 + $0x940] sm:$0xff]  ;;  %v556_v59 = vld [vmem:[%s3991_s1 + $0x8d8] sm:$0xff] }
  0x79   : > { %2496 = vmatpush3.bf16.msra.mxu0 %v2495_v15  ;;  %v2547_v15 = vpack.c.bf16 %v532_v6, %v531_v5  ;;  %v263_v50 = vld [vmem:[%s2876_s18 + $0x2b0] sm:$0xff]  ;;  %v588_v61 = vld [vmem:[%s3991_s1 + $0x9d8] sm:$0xff]  ;;  %v194_v62 = vld [vmem:[%s2876_s18 + $0x88] sm:$0xff] }
  0x7a   : > { %2498 = vmatprep.subr.bf16.mxu0 %v2497_v18  ;;  %v582_v18 = vld [vmem:[%s3991_s1 + $0x9a8] sm:$0xff]  ;;  %v555_v58 = vld [vmem:[%s3991_s1 + $0x8d0] sm:$0xff]  ;;  %v589_v10 = vld [vmem:[%s3991_s1 + $0x9e0] sm:$0xff] }
  0x7b   : > { %2528 = vmatpush3.bf16.msra.mxu1 %v2527_v17  ;;  %v581_v17 = vld [vmem:[%s3991_s1 + $0x9a0] sm:$0xff]  ;;  %v2561_v2 = vpack.c.bf16 %v556_v59, %v555_v58  ;;  %v571_v5 = vld [vmem:[%s3991_s1 + $0x950] sm:$0xff]  ;;  %v558_v9 = vld [vmem:[%s3991_s1 + $0x8e8] sm:$0xff] }
  0x7c   : > { %2530 = vmatprep.subr.bf16.mxu1 %v2529_v22  ;;  %v534_v22 = vld [vmem:[%s3991_s1 + $0x828] sm:$0xff]  ;;  %v543_v27 = vld [vmem:[%s3991_s1 + $0x870] sm:$0xff]  ;;  %v628_v58 = vld [vmem:[%s3991_s1 + $0xb18] sm:$0xff] }
  0x7d   : > { %2500 = vmatpush3.bf16.msra.mxu0 %v2499_v28  ;;  %v2581_v28 = vpack.c.bf16 %v582_v18, %v581_v17  ;;  %v2551_v32 = vpack.c.bf16 %v534_v22, %v533_v21  ;;  %v573_v17 = vld [vmem:[%s3991_s1 + $0x960] sm:$0xff]  ;;  %v560_v21 = vld [vmem:[%s3991_s1 + $0x8f8] sm:$0xff]  ;;  %v591_v22 = vld [vmem:[%s3991_s1 + $0x9f0] sm:$0xff] }
  0x7e   : > { %2502 = vmatprep.subr.bf16.mxu0 %v2501_v30  ;;  %v551_v30 = vld [vmem:[%s3991_s1 + $0x8b0] sm:$0xff]  ;;  %v220_v59 = vld [vmem:[%s2876_s18 + $0x158] sm:$0xff] }
  0x7f   : > { %2532 = vmatpush3.bf16.msra.mxu1 %v2531_v29  ;;  %v239_v29 = vld [vmem:[%s2876_s18 + $0x1f0] sm:$0xff] }
  0x80   : > { %2534 = vmatprep.subr.bf16.mxu1 %v2533_v34  ;;  %v583_v34 = vld [vmem:[%s3991_s1 + $0x9b0] sm:$0xff] }
  0x81   : > { %2504 = vmatpush3.bf16.msra.mxu0 %v2503_v40  ;;  %v2553_v40 = vpack.c.bf16 %v552_v31, %v551_v30  ;;  %v2585_v45 = vpack.c.bf16 %v584_v35, %v583_v34  ;;  %v576_v31 = vld [vmem:[%s3991_s1 + $0x978] sm:$0xff]  ;;  %v641_v34 = vld [vmem:[%s3991_s1 + $0xb80] sm:$0xff]  ;;  %v642_v35 = vld [vmem:[%s3991_s1 + $0xb88] sm:$0xff] }
  0x82   : > { %2506 = vmatprep.subr.bf16.mxu0 %v2505_v42  ;;  %v553_v42 = vld [vmem:[%s3991_s1 + $0x8c0] sm:$0xff] }
  0x83   : > { %2536 = vmatpush3.bf16.msra.mxu1 %v2535_v41  ;;  %v568_v41 = vld [vmem:[%s3991_s1 + $0x938] sm:$0xff] }
  0x84   : > { %2538 = vmatprep.subr.bf16.mxu1 %v2537_v46  ;;  %v585_v46 = vld [vmem:[%s3991_s1 + $0x9c0] sm:$0xff]  ;;  %v2587_v51 = vpack.c.bf16 %v568_v41, %v567_v39  ;;  %v2637_v41 = vpack.c.bf16 %v642_v35, %v641_v34  ;;  %v267_v34 = vld [vmem:[%s2876_s18 + $0x2d0] sm:$0xff] }
  0x85   : > { %2508 = vmatpush3.bf16.msra.mxu0 %v2507_v52  ;;  %v2557_v52 = vpack.c.bf16 %v554_v43, %v553_v42  ;;  %v2589_v56 = vpack.c.bf16 %v586_v47, %v585_v46  ;;  %v593_v39 = vld [vmem:[%s3991_s1 + $0xa00] sm:$0xff]  ;;  %v626_v43 = vld [vmem:[%s3991_s1 + $0xb08] sm:$0xff]  ;;  %v612_v46 = vld [vmem:[%s3991_s1 + $0xa98] sm:$0xff] }
  0x86   : > { %2542 = vmatprep.subr.bf16.mxu0 %v2541_v54  ;;  %v538_v54 = vld [vmem:[%s3991_s1 + $0x848] sm:$0xff]  ;;  %v625_v42 = vld [vmem:[%s3991_s1 + $0xb00] sm:$0xff] }
  0x87   : > { %2540 = vmatpush3.bf16.msra.mxu1 %v2539_v53  ;;  %v537_v53 = vld [vmem:[%s3991_s1 + $0x840] sm:$0xff] }
  0x88   : > { %2574 = vmatprep.subr.bf16.mxu1 %v2573_v57  ;;  %1239 = vmatmul.mubr.f32.vlgmr.msra.gmra.mrb[24].mxu0 %v189_v60  ;;  %v570_v57 = vld [vmem:[%s3991_s1 + $0x948] sm:$0xff]  ;;  %v587_v60 = vld [vmem:[%s3991_s1 + $0x9d0] sm:$0xff] }
  0x89   : > { %2544 = vmatpush3.bf16.msra.mxu0 %v2543_v63  ;;  %1243 = vmatprep.mubr.f32.mxu0 %v214_v4  ;;  %v2559_v63 = vpack.c.bf16 %v538_v54, %v537_v53  ;;  %v2591_v1 = vpack.c.bf16 %v570_v57, %v569_v55  ;;  %v540_v4 = vld [vmem:[%s3991_s1 + $0x858] sm:$0xff]  ;;  %v2593_v6 = vpack.c.bf16 %v588_v61, %v587_v60  ;;  %v595_v53 = vld [vmem:[%s3991_s1 + $0xa10] sm:$0xff]  ;;  %v217_v55 = vld [vmem:[%s2876_s18 + $0x140] sm:$0xff] }
  0x8a   : > { %1324 = vmatmul.mubr.f32.vlgmr.msra.gmra.mrb[24].mxu1 %v191_v0  ;;  %2546 = vmatprep.subr.bf16.mxu0 %v2545_v8  ;;  %v196_v0 = vld [vmem:[%s2876_s18 + $0x98] sm:$0xff]  ;;  %v557_v8 = vld [vmem:[%s3991_s1 + $0x8e0] sm:$0xff]  ;;  %v627_v57 = vld [vmem:[%s3991_s1 + $0xb10] sm:$0xff] }
  0x8b   : > { %2576 = vmatpush3.bf16.msra.mxu1 %v2575_v3  ;;  %1328 = vmatprep.mubr.f32.mxu1 %v216_v11  ;;  %v539_v3 = vld [vmem:[%s3991_s1 + $0x850] sm:$0xff]  ;;  %v590_v11 = vld [vmem:[%s3991_s1 + $0x9e8] sm:$0xff]  ;;  %v2565_v14 = vpack.c.bf16 %v558_v9, %v557_v8  ;;  %v596_v54 = vld [vmem:[%s3991_s1 + $0xa18] sm:$0xff] }
  0x8c   : > { %1244 = vmatmul.mubr.f32.gmra.mrb[26].mxu0 %v213_v7  ;;  %2578 = vmatprep.subr.bf16.mxu1 %v2577_v12  ;;  %v572_v7 = vld [vmem:[%s3991_s1 + $0x958] sm:$0xff]  ;;  %v2563_v12 = vpack.c.bf16 %v540_v4, %v539_v3  ;;  %v2597_v18 = vpack.c.bf16 %v590_v11, %v589_v10  ;;  %v613_v61 = vld [vmem:[%s3991_s1 + $0xaa0] sm:$0xff]  ;;  %v2643_v3 = vpack.c.bf16 %v628_v58, %v627_v57  ;;  %v242_v4 = vld [vmem:[%s2876_s18 + $0x208] sm:$0xff] }
  0x8d   : > { %2548 = vmatpush3.bf16.msra.mxu0 %v2547_v15  ;;  %1248 = vmatprep.mubr.f32.mxu0 %v238_v20  ;;  %v2595_v13 = vpack.c.bf16 %v572_v7, %v571_v5  ;;  %v541_v15 = vld [vmem:[%s3991_s1 + $0x860] sm:$0xff]  ;;  %v559_v20 = vld [vmem:[%s3991_s1 + $0x8f0] sm:$0xff]  ;;  %v244_v9 = vld [vmem:[%s2876_s18 + $0x218] sm:$0xff] }
  0x8e   : > { %1329 = vmatmul.mubr.f32.gmra.mrb[26].mxu1 %v215_v16  ;;  %2550 = vmatprep.subr.bf16.mxu0 %v2549_v24  ;;  %v542_v16 = vld [vmem:[%s3991_s1 + $0x868] sm:$0xff]  ;;  %v2569_v26 = vpack.c.bf16 %v560_v21, %v559_v20  ;;  %v597_v5 = vld [vmem:[%s3991_s1 + $0xa20] sm:$0xff]  ;;  %v599_v21 = vld [vmem:[%s3991_s1 + $0xa30] sm:$0xff] }
  0x8f   : > { %2580 = vmatpush3.bf16.msra.mxu1 %v2579_v19  ;;  %1333 = vmatprep.mubr.f32.mxu1 %v240_v25  ;;  %v574_v19 = vld [vmem:[%s3991_s1 + $0x968] sm:$0xff]  ;;  %v2567_v24 = vpack.c.bf16 %v542_v16, %v541_v15  ;;  %v241_v7 = vld [vmem:[%s2876_s18 + $0x200] sm:$0xff]  ;;  %v616_v15 = vld [vmem:[%s3991_s1 + $0xab8] sm:$0xff] }
  0x90   : > { %1249 = vmatmul.mubr.f32.gmra.mrb[28].mxu0 %v237_v23  ;;  %2582 = vmatprep.subr.bf16.mxu1 %v2581_v28  ;;  %v592_v23 = vld [vmem:[%s3991_s1 + $0x9f8] sm:$0xff]  ;;  %v2599_v25 = vpack.c.bf16 %v574_v19, %v573_v17  ;;  %v629_v10 = vld [vmem:[%s3991_s1 + $0xb20] sm:$0xff]  ;;  %v630_v11 = vld [vmem:[%s3991_s1 + $0xb28] sm:$0xff] }
  0x91   : > { %2552 = vmatpush3.bf16.msra.mxu0 %v2551_v32  ;;  %1253 = vmatprep.mubr.f32.mxu0 %v262_v33  ;;  %v544_v28 = vld [vmem:[%s3991_s1 + $0x878] sm:$0xff]  ;;  %v2601_v30 = vpack.c.bf16 %v592_v23, %v591_v22  ;;  %v609_v32 = vld [vmem:[%s3991_s1 + $0xa80] sm:$0xff]  ;;  %v610_v33 = vld [vmem:[%s3991_s1 + $0xa88] sm:$0xff]  ;;  %v2647_v20 = vpack.c.bf16 %v630_v11, %v629_v10 }
  0x92   : > { %1334 = vmatmul.mubr.f32.gmra.mrb[28].mxu1 %v239_v29  ;;  %2554 = vmatprep.subr.bf16.mxu0 %v2553_v40  ;;  %v575_v29 = vld [vmem:[%s3991_s1 + $0x970] sm:$0xff]  ;;  %v2605_v38 = vpack.c.bf16 %v610_v33, %v609_v32  ;;  %v594_v40 = vld [vmem:[%s3991_s1 + $0xa08] sm:$0xff]  ;;  %v648_v19 = vld [vmem:[%s3991_s1 + $0xbb8] sm:$0xff] }
  0x93   : > { %2584 = vmatpush3.bf16.msra.mxu1 %v2583_v36  ;;  %1338 = vmatprep.mubr.f32.mxu1 %v264_v44  ;;  %v2571_v36 = vpack.c.bf16 %v544_v28, %v543_v27  ;;  %v2603_v37 = vpack.c.bf16 %v576_v31, %v575_v29  ;;  %v193_v44 = vld [vmem:[%s2876_s18 + $0x80] sm:$0xff]  ;;  %v2607_v47 = vpack.c.bf16 %v594_v40, %v593_v39  ;;  %v266_v17 = vld [vmem:[%s2876_s18 + $0x2c8] sm:$0xff]  ;;  %v600_v22 = vld [vmem:[%s3991_s1 + $0xa38] sm:$0xff] }
  0x94   : > { %1254 = vmatmul.mubr.f32.gmra.mrb[30].mxu0 %v261_v48  ;;  %2586 = vmatprep.subr.bf16.mxu1 %v2585_v45  ;;  %v611_v45 = vld [vmem:[%s3991_s1 + $0xa90] sm:$0xff]  ;;  %v618_v27 = vld [vmem:[%s3991_s1 + $0xac8] sm:$0xff]  ;;  %v268_v28 = vld [vmem:[%s2876_s18 + $0x2d8] sm:$0xff]  ;;  %v2619_v33 = vpack.c.bf16 %v600_v22, %v599_v21 }
  0x95   : > { %2556 = vmatpush3.bf16.msra.mxu0 %v2555_v49  ;;  %1408 = vmatprep.mubr.f32.mxu0 %v194_v62  ;;  %v195_v48 = vld [vmem:[%s2876_s18 + $0x90] sm:$0xff]  ;;  %v614_v62 = vld [vmem:[%s3991_s1 + $0xaa8] sm:$0xff]  ;;  %v265_v32 = vld [vmem:[%s2876_s18 + $0x2c0] sm:$0xff] }
  0x96   : > { %1339 = vmatmul.mubr.f32.gmra.mrb[30].mxu1 %v263_v50  ;;  %2558 = vmatprep.subr.bf16.mxu0 %v2557_v52  ;;  %v643_v49 = vld [vmem:[%s3991_s1 + $0xb90] sm:$0xff]  ;;  %v644_v50 = vld [vmem:[%s3991_s1 + $0xb98] sm:$0xff]  ;;  %v218_v52 = vld [vmem:[%s2876_s18 + $0x148] sm:$0xff]  ;;  %v2613_v8 = vpack.c.bf16 %v614_v62, %v613_v61 }
  0x97   : > { %2588 = vmatpush3.bf16.msra.mxu1 %v2587_v51  ;;  %1493 = vmatprep.mubr.f32.mxu1 %v196_v0  ;;  %v2639_v51 = vpack.c.bf16 %v626_v43, %v625_v42  ;;  %v2641_v60 = vpack.c.bf16 %v644_v50, %v643_v49  ;;  %v219_v0 = vld [vmem:[%s2876_s18 + $0x150] sm:$0xff]  ;;  %v650_v31 = vld [vmem:[%s3991_s1 + $0xbc8] sm:$0xff]  ;;  %v633_v39 = vld [vmem:[%s3991_s1 + $0xb40] sm:$0xff] }
  0x98   : > { %2590 = vmatprep.subr.bf16.mxu1 %v2589_v56  ;;  %v2609_v56 = vpack.c.bf16 %v612_v46, %v611_v45  ;;  %v631_v23 = vld [vmem:[%s3991_s1 + $0xb30] sm:$0xff]  ;;  %v620_v43 = vld [vmem:[%s3991_s1 + $0xad8] sm:$0xff]  ;;  %v198_v46 = vld [vmem:[%s2876_s18 + $0xa8] sm:$0xff] }
  0x99   : > { %2560 = vmatpush3.bf16.msra.mxu0 %v2559_v63  ;;  %v2611_v63 = vpack.c.bf16 %v596_v54, %v595_v53  ;;  %v619_v42 = vld [vmem:[%s3991_s1 + $0xad0] sm:$0xff]  ;;  %v652_v45 = vld [vmem:[%s3991_s1 + $0xbd8] sm:$0xff]  ;;  %v622_v57 = vld [vmem:[%s3991_s1 + $0xae8] sm:$0xff] }
  0x9a   : > { %2562 = vmatprep.subr.bf16.mxu0 %v2561_v2  ;;  %v646_v2 = vld [vmem:[%s3991_s1 + $0xba8] sm:$0xff]  ;;  %v2625_v50 = vpack.c.bf16 %v620_v43, %v619_v42  ;;  %v635_v53 = vld [vmem:[%s3991_s1 + $0xb50] sm:$0xff]  ;;  %v653_v58 = vld [vmem:[%s3991_s1 + $0xbe0] sm:$0xff] }
  0x9b   : > { %2592 = vmatpush3.bf16.msra.mxu1 %v2591_v1  ;;  %v645_v1 = vld [vmem:[%s3991_s1 + $0xba0] sm:$0xff]  ;;  %v607_v11 = vld [vmem:[%s3991_s1 + $0xa70] sm:$0xff]  ;;  %v224_v21 = vld [vmem:[%s2876_s18 + $0x178] sm:$0xff] }
  0x9c   : > { %2594 = vmatprep.subr.bf16.mxu1 %v2593_v6  ;;  %v598_v6 = vld [vmem:[%s3991_s1 + $0xa28] sm:$0xff]  ;;  %v221_v22 = vld [vmem:[%s2876_s18 + $0x160] sm:$0xff] }
  0x9d   : > { %2564 = vmatpush3.bf16.msra.mxu0 %v2563_v12  ;;  %v2645_v12 = vpack.c.bf16 %v646_v2, %v645_v1  ;;  %v2615_v16 = vpack.c.bf16 %v598_v6, %v597_v5  ;;  %v637_v1 = vld [vmem:[%s3991_s1 + $0xb60] sm:$0xff]  ;;  %v624_v5 = vld [vmem:[%s3991_s1 + $0xaf8] sm:$0xff]  ;;  %v655_v6 = vld [vmem:[%s3991_s1 + $0xbf0] sm:$0xff] }
  0x9e   : > { %2566 = vmatprep.subr.bf16.mxu0 %v2565_v14  ;;  %v615_v14 = vld [vmem:[%s3991_s1 + $0xab0] sm:$0xff] }
  0x9f   : > { %2596 = vmatpush3.bf16.msra.mxu1 %v2595_v13  ;;  %v243_v13 = vld [vmem:[%s2876_s18 + $0x210] sm:$0xff] }
  0xa0   : > { %2598 = vmatprep.subr.bf16.mxu1 %v2597_v18  ;;  %v647_v18 = vld [vmem:[%s3991_s1 + $0xbb0] sm:$0xff] }
  0xa1   : > { %2568 = vmatpush3.bf16.msra.mxu0 %v2567_v24  ;;  %v2617_v24 = vpack.c.bf16 %v616_v15, %v615_v14  ;;  %v2649_v29 = vpack.c.bf16 %v648_v19, %v647_v18  ;;  %v639_v14 = vld [vmem:[%s3991_s1 + $0xb70] sm:$0xff]  ;;  %v640_v15 = vld [vmem:[%s3991_s1 + $0xb78] sm:$0xff]  ;;  %v197_v18 = vld [vmem:[%s2876_s18 + $0xa0] sm:$0xff] }
  0xa2   : > { %2570 = vmatprep.subr.bf16.mxu0 %v2569_v26  ;;  %v617_v26 = vld [vmem:[%s3991_s1 + $0xac0] sm:$0xff]  ;;  %v199_v19 = vld [vmem:[%s2876_s18 + $0xb0] sm:$0xff] }
  0xa3   : > { %2600 = vmatpush3.bf16.msra.mxu1 %v2599_v25  ;;  %v632_v25 = vld [vmem:[%s3991_s1 + $0xb38] sm:$0xff] }
  0xa4   : > { %2602 = vmatprep.subr.bf16.mxu1 %v2601_v30  ;;  %v649_v30 = vld [vmem:[%s3991_s1 + $0xbc0] sm:$0xff]  ;;  %v2651_v35 = vpack.c.bf16 %v632_v25, %v631_v23  ;;  %v223_v23 = vld [vmem:[%s2876_s18 + $0x170] sm:$0xff]  ;;  %v248_v25 = vld [vmem:[%s2876_s18 + $0x238] sm:$0xff] }
  0xa5   : > { %2572 = vmatpush3.bf16.msra.mxu0 %v2571_v36  ;;  %v2621_v36 = vpack.c.bf16 %v618_v27, %v617_v26  ;;  %v2653_v40 = vpack.c.bf16 %v650_v31, %v649_v30  ;;  %v245_v26 = vld [vmem:[%s2876_s18 + $0x220] sm:$0xff]  ;;  %v247_v27 = vld [vmem:[%s2876_s18 + $0x230] sm:$0xff] }
  0xa6   : > { %2606 = vmatprep.subr.bf16.mxu0 %v2605_v38  ;;  %v602_v38 = vld [vmem:[%s3991_s1 + $0xa48] sm:$0xff]  ;;  %v269_v30 = vld [vmem:[%s2876_s18 + $0x2e0] sm:$0xff]  ;;  %v271_v31 = vld [vmem:[%s2876_s18 + $0x2f0] sm:$0xff] }
  0xa7   : > { %2604 = vmatpush3.bf16.msra.mxu1 %v2603_v37  ;;  %v601_v37 = vld [vmem:[%s3991_s1 + $0xa40] sm:$0xff] }
  0xa8   : > { %2638 = vmatprep.subr.bf16.mxu1 %v2637_v41  ;;  %1409 = vmatmul.mubr.f32.vlgmr.msra.gmra.mrb[32].mxu0 %v193_v44  ;;  %v634_v41 = vld [vmem:[%s3991_s1 + $0xb48] sm:$0xff]  ;;  %v651_v44 = vld [vmem:[%s3991_s1 + $0xbd0] sm:$0xff] }
  0xa9   : > { %2608 = vmatpush3.bf16.msra.mxu0 %v2607_v47  ;;  %1413 = vmatprep.mubr.f32.mxu0 %v218_v52  ;;  %v2623_v47 = vpack.c.bf16 %v602_v38, %v601_v37  ;;  %v2655_v49 = vpack.c.bf16 %v634_v41, %v633_v39  ;;  %v604_v52 = vld [vmem:[%s3991_s1 + $0xa58] sm:$0xff]  ;;  %v2657_v54 = vpack.c.bf16 %v652_v45, %v651_v44 }
  0xaa   : > { %1494 = vmatmul.mubr.f32.vlgmr.msra.gmra.mrb[32].mxu1 %v195_v48  ;;  %2610 = vmatprep.subr.bf16.mxu0 %v2609_v56  ;;  %v200_v48 = vld [vmem:[%s2876_s18 + $0xb8] sm:$0xff]  ;;  %v621_v56 = vld [vmem:[%s3991_s1 + $0xae0] sm:$0xff] }
  0xab   : > { %2640 = vmatpush3.bf16.msra.mxu1 %v2639_v51  ;;  %1498 = vmatprep.mubr.f32.mxu1 %v220_v59  ;;  %v603_v51 = vld [vmem:[%s3991_s1 + $0xa50] sm:$0xff]  ;;  %v654_v59 = vld [vmem:[%s3991_s1 + $0xbe8] sm:$0xff]  ;;  %v2629_v62 = vpack.c.bf16 %v622_v57, %v621_v56 }
  0xac   : > { %1414 = vmatmul.mubr.f32.gmra.mrb[34].mxu0 %v217_v55  ;;  %2642 = vmatprep.subr.bf16.mxu1 %v2641_v60  ;;  %v636_v55 = vld [vmem:[%s3991_s1 + $0xb58] sm:$0xff]  ;;  %v2627_v60 = vpack.c.bf16 %v604_v52, %v603_v51  ;;  %v2661_v2 = vpack.c.bf16 %v654_v59, %v653_v58 }
  0xad   : > { %2612 = vmatpush3.bf16.msra.mxu0 %v2611_v63  ;;  %1418 = vmatprep.mubr.f32.mxu0 %v242_v4  ;;  %v2659_v61 = vpack.c.bf16 %v636_v55, %v635_v53  ;;  %v605_v63 = vld [vmem:[%s3991_s1 + $0xa60] sm:$0xff]  ;;  %v623_v4 = vld [vmem:[%s3991_s1 + $0xaf0] sm:$0xff] }
  0xae   : > { %1499 = vmatmul.mubr.f32.gmra.mrb[34].mxu1 %v219_v0  ;;  %2614 = vmatprep.subr.bf16.mxu0 %v2613_v8  ;;  %v606_v0 = vld [vmem:[%s3991_s1 + $0xa68] sm:$0xff]  ;;  %v2633_v10 = vpack.c.bf16 %v624_v5, %v623_v4 }
  0xaf   : > { %2644 = vmatpush3.bf16.msra.mxu1 %v2643_v3  ;;  %1503 = vmatprep.mubr.f32.mxu1 %v244_v9  ;;  %v638_v3 = vld [vmem:[%s3991_s1 + $0xb68] sm:$0xff]  ;;  %v2631_v8 = vpack.c.bf16 %v606_v0, %v605_v63 }
  0xb0   : > { %1419 = vmatmul.mubr.f32.gmra.mrb[36].mxu0 %v241_v7  ;;  %2646 = vmatprep.subr.bf16.mxu1 %v2645_v12  ;;  %v656_v7 = vld [vmem:[%s3991_s1 + $0xbf8] sm:$0xff]  ;;  %v2663_v9 = vpack.c.bf16 %v638_v3, %v637_v1 }
  0xb1   : > { %2616 = vmatpush3.bf16.msra.mxu0 %v2615_v16  ;;  %1423 = vmatprep.mubr.f32.mxu0 %v266_v17  ;;  %v608_v12 = vld [vmem:[%s3991_s1 + $0xa78] sm:$0xff]  ;;  %v2667_v17 = vpack.c.bf16 %v640_v15, %v639_v14 }
  0xb2   : > { %1504 = vmatmul.mubr.f32.gmra.mrb[36].mxu1 %v243_v13  ;;  %2618 = vmatprep.subr.bf16.mxu0 %v2617_v24  ;;  %v2665_v13 = vpack.c.bf16 %v656_v7, %v655_v6  ;;  %v2635_v16 = vpack.c.bf16 %v608_v12, %v607_v11  ;;  %v246_v24 = vld [vmem:[%s2876_s18 + $0x228] sm:$0xff] }
  0xb3   : > { %2648 = vmatpush3.bf16.msra.mxu1 %v2647_v20  ;;  %1508 = vmatprep.mubr.f32.mxu1 %v268_v28  ;;  %v222_v20 = vld [vmem:[%s2876_s18 + $0x168] sm:$0xff] }
  0xb4   : > { %1424 = vmatmul.mubr.f32.gmra.mrb[38].mxu0 %v265_v32  ;;  %2650 = vmatprep.subr.bf16.mxu1 %v2649_v29  ;;  %v270_v28 = vld [vmem:[%s2876_s18 + $0x2e8] sm:$0xff]  ;;  %v272_v29 = vld [vmem:[%s2876_s18 + $0x2f8] sm:$0xff]  ;;  %s1753_s18 = sshll.u32 %s3995_s11, 3 }
  0xb5   : > { %2620 = vmatpush3.bf16.msra.mxu0 %v2619_v33  ;;  %1578 = vmatprep.mubr.f32.mxu0 %v198_v46  ;;  %v1754_v33 = vld [vmem:[%s3992_s2] ss:$0 sm:$0xff]  ;;  %s175_s19 = scalar_lea.vmem %s3993_s3, %s1753_s18 }
  0xb6   : > { %1509 = vmatmul.mubr.f32.gmra.mrb[38].mxu1 %v267_v34  ;;  %2622 = vmatprep.subr.bf16.mxu0 %v2621_v36 }
  0xb7   : > { %2652 = vmatpush3.bf16.msra.mxu1 %v2651_v35  ;;  %1663 = vmatprep.mubr.f32.mxu1 %v200_v48 }
  0xb8   : > { %2654 = vmatprep.subr.bf16.mxu1 %v2653_v40 }
  0xb9   : > { %2624 = vmatpush3.bf16.msra.mxu0 %v2623_v47 }
  0xba   : > { %2626 = vmatprep.subr.bf16.mxu0 %v2625_v50 }
  0xbb   : > { %2656 = vmatpush3.bf16.msra.mxu1 %v2655_v49 }
  0xbc   : > { %2658 = vmatprep.subr.bf16.mxu1 %v2657_v54 }
  0xbd   : > { %2628 = vmatpush3.bf16.msra.mxu0 %v2627_v60 }
  0xbe   : > { %2630 = vmatprep.subr.bf16.mxu0 %v2629_v62 }
  0xbf   : > { %2660 = vmatpush3.bf16.msra.mxu1 %v2659_v61 }
  0xc0   : > { %2662 = vmatprep.subr.bf16.mxu1 %v2661_v2 }
  0xc1   : > { %2632 = vmatpush3.bf16.msra.mxu0 %v2631_v8 }
  0xc2   : > { %2634 = vmatprep.subr.bf16.mxu0 %v2633_v10 }
  0xc3   : > { %2664 = vmatpush3.bf16.msra.mxu1 %v2663_v9 }
  0xc4   : > { %2666 = vmatprep.subr.bf16.mxu1 %v2665_v13 }
  0xc5   : > { %2636 = vmatpush3.bf16.msra.mxu0 %v2635_v16 }
  0xc7   : > { %2668 = vmatpush3.bf16.msra.mxu1 %v2667_v17 }
  0xc8   : > { %1579 = vmatmul.mubr.f32.vlgmr.msra.gmra.mrb[40].mxu0 %v197_v18 }
  0xc9   : > { %1583 = vmatprep.mubr.f32.mxu0 %v222_v20 }
  0xca   : > { %1664 = vmatmul.mubr.f32.vlgmr.msra.gmra.mrb[40].mxu1 %v199_v19 }
  0xcb   : > { %1668 = vmatprep.mubr.f32.mxu1 %v224_v21 }
  0xcc   : > { %1584 = vmatmul.mubr.f32.gmra.mrb[42].mxu0 %v221_v22 }
  0xcd   : > { %1588 = vmatprep.mubr.f32.mxu0 %v246_v24 }
  0xce   : > { %1669 = vmatmul.mubr.f32.gmra.mrb[42].mxu1 %v223_v23 }
  0xcf   : > { %1673 = vmatprep.mubr.f32.mxu1 %v248_v25 }
  0xd0   : > { %1589 = vmatmul.mubr.f32.gmra.mrb[44].mxu0 %v245_v26 }
  0xd1   : > { %1593 = vmatprep.mubr.f32.mxu0 %v270_v28 }
  0xd2   : > { %1674 = vmatmul.mubr.f32.gmra.mrb[44].mxu1 %v247_v27 }
  0xd3   : > { %1678 = vmatprep.mubr.f32.mxu1 %v272_v29 }
  0xd4   : > { %1594 = vmatmul.mubr.f32.gmra.mrb[46].mxu0 %v269_v30 }
  0xd6   : > { %1679 = vmatmul.mubr.f32.gmra.mrb[46].mxu1 %v271_v31 }
  0xfb   : > { %v1789_v32 = vpop.f32.mrb[0].mxu0 }
  0xfc   : > { %v1790_v34 = vpop.f32.mrb[1].mxu0 }
  0xfd   : > { %v1833_v35 = vpop.f32.mrb[0].mxu1  ;;  %v1791_v36 = vadd.f32 %v1790_v34, %v1789_v32 }
  0xfe   : > { %v1834_v37 = vpop.f32.mrb[1].mxu1 }
  0xff   : > { %v1835_v38 = vadd.f32 %v1834_v37, %v1833_v35  ;;  %v731_v39 = vadd.f32 %v1791_v36, %v1754_v33  ;;  %v1792_v40 = vpop.f32.mrb[2].mxu0 }
 0x100   : > { %v1793_v41 = vpop.f32.mrb[3].mxu0 }
 0x101   : > { %v1836_v42 = vpop.f32.mrb[2].mxu1  ;;  %v816_v43 = vadd.f32 %v1835_v38, %v731_v39  ;;  %v1794_v44 = vadd.f32 %v1793_v41, %v1792_v40 }
 0x102   : > { %v1837_v45 = vpop.f32.mrb[3].mxu1 }
 0x103   : > { %v1838_v46 = vadd.f32 %v1837_v45, %v1836_v42  ;;  %v736_v47 = vadd.f32 %v1794_v44, %v1754_v33  ;;  %v1795_v48 = vpop.f32.mrb[4].mxu0 }
 0x104   : > { %v1796_v49 = vpop.f32.mrb[5].mxu0 }
 0x105   : > { %v1839_v50 = vpop.f32.mrb[4].mxu1  ;;  %v821_v51 = vadd.f32 %v1838_v46, %v736_v47  ;;  %v1797_v52 = vadd.f32 %v1796_v49, %v1795_v48 }
 0x106   : > { %v1840_v53 = vpop.f32.mrb[5].mxu1 }
 0x107   : > { %v1841_v54 = vadd.f32 %v1840_v53, %v1839_v50  ;;  %v741_v55 = vadd.f32 %v1797_v52, %v1754_v33  ;;  %v1798_v56 = vpop.f32.mrb[6].mxu0 }
 0x108   : > { %v1799_v57 = vpop.f32.mrb[7].mxu0 }
 0x109   : > { %v1842_v58 = vpop.f32.mrb[6].mxu1  ;;  %v826_v59 = vadd.f32 %v1841_v54, %v741_v55  ;;  %v1800_v60 = vadd.f32 %v1799_v57, %v1798_v56 }
 0x10a   : > { %v1843_v61 = vpop.f32.mrb[7].mxu1 }
 0x10b   : > { %v1844_v62 = vadd.f32 %v1843_v61, %v1842_v58  ;;  %v746_v63 = vadd.f32 %v1800_v60, %v1754_v33 }
 0x10d   : > { %v831_v0 = vadd.f32 %v1844_v62, %v746_v63 }
 0x11b   : > { %v1877_v1 = vpop.f32.mrb[8].mxu0 }
 0x11c   : > { %v1878_v2 = vpop.f32.mrb[9].mxu0 }
 0x11d   : > { %v1921_v3 = vpop.f32.mrb[8].mxu1  ;;  %v1879_v4 = vadd.f32 %v1878_v2, %v1877_v1 }
 0x11e   : > { %v1922_v5 = vpop.f32.mrb[9].mxu1 }
 0x11f   : > { %v1923_v6 = vadd.f32 %v1922_v5, %v1921_v3  ;;  %v901_v7 = vadd.f32 %v1879_v4, %v816_v43  ;;  %v1880_v8 = vpop.f32.mrb[10].mxu0 }
 0x120   : > { %v1881_v9 = vpop.f32.mrb[11].mxu0 }
 0x121   : > { %v1924_v10 = vpop.f32.mrb[10].mxu1  ;;  %v986_v11 = vadd.f32 %v1923_v6, %v901_v7  ;;  %v1882_v12 = vadd.f32 %v1881_v9, %v1880_v8 }
 0x122   : > { %v1925_v13 = vpop.f32.mrb[11].mxu1 }
 0x123   : > { %v1926_v14 = vadd.f32 %v1925_v13, %v1924_v10  ;;  %v906_v15 = vadd.f32 %v1882_v12, %v821_v51  ;;  %v1883_v16 = vpop.f32.mrb[12].mxu0 }
 0x124   : > { %v1884_v17 = vpop.f32.mrb[13].mxu0 }
 0x125   : > { %v1927_v18 = vpop.f32.mrb[12].mxu1  ;;  %v991_v19 = vadd.f32 %v1926_v14, %v906_v15  ;;  %v1885_v20 = vadd.f32 %v1884_v17, %v1883_v16 }
 0x126   : > { %v1928_v21 = vpop.f32.mrb[13].mxu1 }
 0x127   : > { %v1929_v22 = vadd.f32 %v1928_v21, %v1927_v18  ;;  %v911_v23 = vadd.f32 %v1885_v20, %v826_v59  ;;  %v1886_v24 = vpop.f32.mrb[14].mxu0 }
 0x128   : > { %v1887_v25 = vpop.f32.mrb[15].mxu0 }
 0x129   : > { %v1930_v26 = vpop.f32.mrb[14].mxu1  ;;  %v996_v27 = vadd.f32 %v1929_v22, %v911_v23  ;;  %v1888_v28 = vadd.f32 %v1887_v25, %v1886_v24 }
 0x12a   : > { %v1931_v29 = vpop.f32.mrb[15].mxu1 }
 0x12b   : > { %v1932_v30 = vadd.f32 %v1931_v29, %v1930_v26  ;;  %v916_v31 = vadd.f32 %v1888_v28, %v831_v0 }
 0x12d   : > { %v1001_v32 = vadd.f32 %v1932_v30, %v916_v31 }
 0x13b   : > { %v1965_v33 = vpop.f32.mrb[16].mxu0 }
 0x13c   : > { %v1966_v34 = vpop.f32.mrb[17].mxu0 }
 0x13d   : > { %v2009_v35 = vpop.f32.mrb[16].mxu1  ;;  %v1967_v36 = vadd.f32 %v1966_v34, %v1965_v33 }
 0x13e   : > { %v2010_v37 = vpop.f32.mrb[17].mxu1 }
 0x13f   : > { %v2011_v38 = vadd.f32 %v2010_v37, %v2009_v35  ;;  %v1071_v39 = vadd.f32 %v1967_v36, %v986_v11  ;;  %v1968_v40 = vpop.f32.mrb[18].mxu0 }
 0x140   : > { %v1969_v41 = vpop.f32.mrb[19].mxu0 }
 0x141   : > { %v2012_v42 = vpop.f32.mrb[18].mxu1  ;;  %v1156_v43 = vadd.f32 %v2011_v38, %v1071_v39  ;;  %v1970_v44 = vadd.f32 %v1969_v41, %v1968_v40 }
 0x142   : > { %v2013_v45 = vpop.f32.mrb[19].mxu1 }
 0x143   : > { %v2014_v46 = vadd.f32 %v2013_v45, %v2012_v42  ;;  %v1076_v47 = vadd.f32 %v1970_v44, %v991_v19  ;;  %v1971_v48 = vpop.f32.mrb[20].mxu0 }
 0x144   : > { %v1972_v49 = vpop.f32.mrb[21].mxu0 }
 0x145   : > { %v2015_v50 = vpop.f32.mrb[20].mxu1  ;;  %v1161_v51 = vadd.f32 %v2014_v46, %v1076_v47  ;;  %v1973_v52 = vadd.f32 %v1972_v49, %v1971_v48 }
 0x146   : > { %v2016_v53 = vpop.f32.mrb[21].mxu1 }
 0x147   : > { %v2017_v54 = vadd.f32 %v2016_v53, %v2015_v50  ;;  %v1081_v55 = vadd.f32 %v1973_v52, %v996_v27  ;;  %v1974_v56 = vpop.f32.mrb[22].mxu0 }
 0x148   : > { %v1975_v57 = vpop.f32.mrb[23].mxu0 }
 0x149   : > { %v2018_v58 = vpop.f32.mrb[22].mxu1  ;;  %v1166_v59 = vadd.f32 %v2017_v54, %v1081_v55  ;;  %v1976_v60 = vadd.f32 %v1975_v57, %v1974_v56 }
 0x14a   : > { %v2019_v61 = vpop.f32.mrb[23].mxu1 }
 0x14b   : > { %v2020_v62 = vadd.f32 %v2019_v61, %v2018_v58  ;;  %v1086_v63 = vadd.f32 %v1976_v60, %v1001_v32 }
 0x14d   : > { %v1171_v0 = vadd.f32 %v2020_v62, %v1086_v63 }
 0x15b   : > { %v2053_v1 = vpop.f32.mrb[24].mxu0 }
 0x15c   : > { %v2054_v2 = vpop.f32.mrb[25].mxu0 }
 0x15d   : > { %v2097_v3 = vpop.f32.mrb[24].mxu1  ;;  %v2055_v4 = vadd.f32 %v2054_v2, %v2053_v1 }
 0x15e   : > { %v2098_v5 = vpop.f32.mrb[25].mxu1 }
 0x15f   : > { %v2099_v6 = vadd.f32 %v2098_v5, %v2097_v3  ;;  %v1241_v7 = vadd.f32 %v2055_v4, %v1156_v43  ;;  %v2056_v8 = vpop.f32.mrb[26].mxu0 }
 0x160   : > { %v2057_v9 = vpop.f32.mrb[27].mxu0 }
 0x161   : > { %v2100_v10 = vpop.f32.mrb[26].mxu1  ;;  %v1326_v11 = vadd.f32 %v2099_v6, %v1241_v7  ;;  %v2058_v12 = vadd.f32 %v2057_v9, %v2056_v8 }
 0x162   : > { %v2101_v13 = vpop.f32.mrb[27].mxu1 }
 0x163   : > { %v2102_v14 = vadd.f32 %v2101_v13, %v2100_v10  ;;  %v1246_v15 = vadd.f32 %v2058_v12, %v1161_v51  ;;  %v2059_v16 = vpop.f32.mrb[28].mxu0 }
 0x164   : > { %v2060_v17 = vpop.f32.mrb[29].mxu0 }
 0x165   : > { %v2103_v18 = vpop.f32.mrb[28].mxu1  ;;  %v1331_v19 = vadd.f32 %v2102_v14, %v1246_v15  ;;  %v2061_v20 = vadd.f32 %v2060_v17, %v2059_v16 }
 0x166   : > { %v2104_v21 = vpop.f32.mrb[29].mxu1 }
 0x167   : > { %v2105_v22 = vadd.f32 %v2104_v21, %v2103_v18  ;;  %v1251_v23 = vadd.f32 %v2061_v20, %v1166_v59  ;;  %v2062_v24 = vpop.f32.mrb[30].mxu0 }
 0x168   : > { %v2063_v25 = vpop.f32.mrb[31].mxu0 }
 0x169   : > { %v2106_v26 = vpop.f32.mrb[30].mxu1  ;;  %v1336_v27 = vadd.f32 %v2105_v22, %v1251_v23  ;;  %v2064_v28 = vadd.f32 %v2063_v25, %v2062_v24 }
 0x16a   : > { %v2107_v29 = vpop.f32.mrb[31].mxu1 }
 0x16b   : > { %v2108_v30 = vadd.f32 %v2107_v29, %v2106_v26  ;;  %v1256_v31 = vadd.f32 %v2064_v28, %v1171_v0 }
 0x16d   : > { %v1341_v32 = vadd.f32 %v2108_v30, %v1256_v31 }
 0x17b   : > { %v2141_v33 = vpop.f32.mrb[32].mxu0 }
 0x17c   : > { %v2142_v34 = vpop.f32.mrb[33].mxu0 }
 0x17d   : > { %v2185_v35 = vpop.f32.mrb[32].mxu1  ;;  %v2143_v36 = vadd.f32 %v2142_v34, %v2141_v33 }
 0x17e   : > { %v2186_v37 = vpop.f32.mrb[33].mxu1 }
 0x17f   : > { %v2187_v38 = vadd.f32 %v2186_v37, %v2185_v35  ;;  %v1411_v39 = vadd.f32 %v2143_v36, %v1326_v11  ;;  %v2144_v40 = vpop.f32.mrb[34].mxu0 }
 0x180   : > { %v2145_v41 = vpop.f32.mrb[35].mxu0 }
 0x181   : > { %v2188_v42 = vpop.f32.mrb[34].mxu1  ;;  %v1496_v43 = vadd.f32 %v2187_v38, %v1411_v39  ;;  %v2146_v44 = vadd.f32 %v2145_v41, %v2144_v40 }
 0x182   : > { %v2189_v45 = vpop.f32.mrb[35].mxu1 }
 0x183   : > { %v2190_v46 = vadd.f32 %v2189_v45, %v2188_v42  ;;  %v1416_v47 = vadd.f32 %v2146_v44, %v1331_v19  ;;  %v2147_v48 = vpop.f32.mrb[36].mxu0 }
 0x184   : > { %v2148_v49 = vpop.f32.mrb[37].mxu0 }
 0x185   : > { %v2191_v50 = vpop.f32.mrb[36].mxu1  ;;  %v1501_v51 = vadd.f32 %v2190_v46, %v1416_v47  ;;  %v2149_v52 = vadd.f32 %v2148_v49, %v2147_v48 }
 0x186   : > { %v2192_v53 = vpop.f32.mrb[37].mxu1 }
 0x187   : > { %v2193_v54 = vadd.f32 %v2192_v53, %v2191_v50  ;;  %v1421_v55 = vadd.f32 %v2149_v52, %v1336_v27  ;;  %v2150_v56 = vpop.f32.mrb[38].mxu0 }
 0x188   : > { %v2151_v57 = vpop.f32.mrb[39].mxu0 }
 0x189   : > { %v2194_v58 = vpop.f32.mrb[38].mxu1  ;;  %v1506_v59 = vadd.f32 %v2193_v54, %v1421_v55  ;;  %v2152_v60 = vadd.f32 %v2151_v57, %v2150_v56 }
 0x18a   : > { %v2195_v61 = vpop.f32.mrb[39].mxu1 }
 0x18b   : > { %v2196_v62 = vadd.f32 %v2195_v61, %v2194_v58  ;;  %v1426_v63 = vadd.f32 %v2152_v60, %v1341_v32 }
 0x18d   : > { %v1511_v0 = vadd.f32 %v2196_v62, %v1426_v63 }
 0x19b   : > { %v2229_v1 = vpop.f32.mrb[40].mxu0 }
 0x19c   : > { %v2230_v2 = vpop.f32.mrb[41].mxu0 }
 0x19d   : > { %v2273_v3 = vpop.f32.mrb[40].mxu1  ;;  %v2231_v4 = vadd.f32 %v2230_v2, %v2229_v1 }
 0x19e   : > { %v2274_v5 = vpop.f32.mrb[41].mxu1 }
 0x19f   : > { %v2275_v6 = vadd.f32 %v2274_v5, %v2273_v3  ;;  %v1581_v7 = vadd.f32 %v2231_v4, %v1496_v43  ;;  %v2232_v8 = vpop.f32.mrb[42].mxu0 }
 0x1a0   : > { %v2233_v9 = vpop.f32.mrb[43].mxu0 }
 0x1a1   : > { %v2276_v10 = vpop.f32.mrb[42].mxu1  ;;  %v1666_v11 = vadd.f32 %v2275_v6, %v1581_v7  ;;  %v2234_v12 = vadd.f32 %v2233_v9, %v2232_v8 }
 0x1a2   : > { %v2277_v13 = vpop.f32.mrb[43].mxu1 }
 0x1a3   : > { %v2278_v14 = vadd.f32 %v2277_v13, %v2276_v10  ;;  %1685 = vst.msk [vmem:[%s175_s19] sm:$0xff] %vm1684_vm0, %v1666_v11  ;;  %v1586_v15 = vadd.f32 %v2234_v12, %v1501_v51  ;;  %v2235_v16 = vpop.f32.mrb[44].mxu0 }
 0x1a4   : > { %v2236_v17 = vpop.f32.mrb[45].mxu0 }
 0x1a5   : > { %v2279_v18 = vpop.f32.mrb[44].mxu1  ;;  %v1671_v19 = vadd.f32 %v2278_v14, %v1586_v15  ;;  %v2237_v20 = vadd.f32 %v2236_v17, %v2235_v16 }
 0x1a6   : > { %v2280_v21 = vpop.f32.mrb[45].mxu1 }
 0x1a7   : > { %v2281_v22 = vadd.f32 %v2280_v21, %v2279_v18  ;;  %1686 = vst.msk [vmem:[%s175_s19 + $0x8] sm:$0xff] %vm1684_vm0, %v1671_v19  ;;  %v1591_v23 = vadd.f32 %v2237_v20, %v1506_v59  ;;  %v2238_v24 = vpop.f32.mrb[46].mxu0 }
 0x1a8   : > { %v2239_v25 = vpop.f32.mrb[47].mxu0 }
 0x1a9   : > { %v2282_v26 = vpop.f32.mrb[46].mxu1  ;;  %v1676_v27 = vadd.f32 %v2281_v22, %v1591_v23  ;;  %v2240_v28 = vadd.f32 %v2239_v25, %v2238_v24 }
 0x1aa   : > { %v2283_v29 = vpop.f32.mrb[47].mxu1 }
 0x1ab   : > { %v2284_v30 = vadd.f32 %v2283_v29, %v2282_v26  ;;  %1687 = vst.msk [vmem:[%s175_s19 + $0x10] sm:$0xff] %vm1684_vm0, %v1676_v27  ;;  %v1596_v31 = vadd.f32 %v2240_v28, %v1511_v0 }
 0x1ad   : > { %v1681_v32 = vadd.f32 %v2284_v30, %v1596_v31 }
 0x1af   : > { %1688 = vst.msk [vmem:[%s175_s19 + $0x18] sm:$0xff] %vm1684_vm0, %v1681_v32 }
 0x1b0 PF: > { %s13_s12 = sadd.s32 1, %s2684_s12  }
 0x1b1   : > { %p10_p4 = scmp.ge.s32.totalorder %s13_s12, 4  }
 0x1b3   :  { %12 = sbr.rel (!%p10_p4) target bundleno = 1 (0x1), region = 62 }

</bundles_post_ra>
